<compile_context>
chip_gen: v6e
topology: v6e:2x2x1
jax: 0.10.0
libtpu: 0.0.40
codegen_flags: <defaults>
</compile_context>

<pallas_src>
import functools

import numpy as np
import jax
import jax.numpy as jnp
from jax.experimental import pallas as pl
from jax.experimental.pallas import tpu as pltpu

# Nature-CNN architecture constants.
K1, ST1 = 8, 4
K2, ST2 = 4, 2
K3, ST3 = 3, 1
DEPTHS = (32, 64, 64)
FINAL = 512


def _conv_out(n, k, s):
    return (n - k) // s + 1


def _spatial_shapes(h, w):
    h1, w1 = _conv_out(h, K1, ST1), _conv_out(w, K1, ST1)
    h2, w2 = _conv_out(h1, K2, ST2), _conv_out(w1, K2, ST2)
    h3, w3 = _conv_out(h2, K3, ST3), _conv_out(w2, K3, ST3)
    return (h1, w1), (h2, w2), (h3, w3)


# ----------------------------------------------------------------------------
# Fused kernel: conv1 -> conv2 -> conv3 -> fc1 -> fc2 for ONE batch element.
# ----------------------------------------------------------------------------
def _make_kernel(H1, W1, H2, W2, H3, W3, Gw):
    C1, C2, C3 = DEPTHS
    Qh, Qw = H1 // 2, W1 // 2          # per-parity-class conv1 output grid

    def kernel(x_ref, w1_ref, b1_ref, w2_ref, b2_ref, w3_ref, b3_ref,
               fw1_ref, fb1_ref, fw2_ref, fb2_ref, out_ref):
        bf16, f32 = jnp.bfloat16, jnp.float32
        xb = x_ref[0]                                      # (Gh*Gw, 64*C) f32

        # ---- conv1 + ReLU (one matmul for all 4 output-parity classes) ----
        # rows = per-class output positions (Qh x Qw), K = 4 super-pixel
        # quadrants, N = (parity class, channel) = 128 lanes (lane dense).
        quads = []
        for a in range(2):
            for b in range(2):
                rows = []
                for qh in range(Qh):
                    r0 = (qh + a) * Gw + b
                    rows.append(xb[r0:r0 + Qw, :])          # (Qw, 64*C)
                quads.append(jnp.concatenate(rows, axis=0))  # (Qh*Qw, 64*C)
        p1 = jnp.concatenate(quads, axis=1)                  # (Qh*Qw, 4*64*C)
        y1 = jnp.dot(p1.astype(bf16), w1_ref[...], preferred_element_type=f32)
        y1 = jnp.maximum(y1 + b1_ref[...], 0.0)              # (Qh*Qw, 4*C1)

        # ---- conv2 (k=4, s=2) + ReLU --------------------------------------
        # y1 columns are grouped by parity class, so the stride-2 patch
        # extraction is plain contiguous slicing (in-kernel im2col).
        blocks = []
        for i2 in range(K2):
            for j2 in range(K2):
                cls = (i2 % 2) * 2 + (j2 % 2)
                a2, b2 = i2 // 2, j2 // 2
                rows = []
                for t in range(H2):
                    r0 = (t + a2) * Qw + b2
                    rows.append(y1[r0:r0 + W2, cls * C1:(cls + 1) * C1])
                blocks.append(jnp.concatenate(rows, axis=0))  # (H2*W2, C1)
        p2 = jnp.concatenate(blocks, axis=1)                  # (H2*W2, 16*C1)
        y2 = jnp.dot(p2.astype(bf16), w2_ref[...], preferred_element_type=f32)
        y2 = jnp.maximum(y2 + b2_ref[...], 0.0)               # (H2*W2, C2)

        # ---- conv3 (k=3, s=1) + ReLU --------------------------------------
        blocks = []
        for i3 in range(K3):
            for j3 in range(K3):
                rows = []
                for t in range(H3):
                    r0 = (i3 + t) * W2 + j3
                    rows.append(y2[r0:r0 + W3, :])
                blocks.append(jnp.concatenate(rows, axis=0))  # (H3*W3, C2)
        p3 = jnp.concatenate(blocks, axis=1)                  # (H3*W3, 9*C2)
        y3 = jnp.dot(p3.astype(bf16), w3_ref[...], preferred_element_type=f32)
        y3 = jnp.maximum(y3 + b3_ref[...], 0.0)               # (H3*W3, C3)

        # ---- Flatten + fc1 + ReLU (fc1 rows pre-permuted at pack time) -----
        h = fb1_ref[...]                                      # (1, 512) f32
        for s in range(H3 * W3):
            h = h + jnp.dot(y3[s:s + 1, :].astype(bf16),
                            fw1_ref[s * C3:(s + 1) * C3, :],
                            preferred_element_type=f32)
        h = jnp.maximum(h, 0.0)

        # ---- fc2 (Q values), lane-dense 128-wide padded output -------------
        q = jnp.dot(h.astype(bf16), fw2_ref[...],
                    preferred_element_type=f32) + fb2_ref[...]
        out_ref[0] = q                                        # (1, A_pad)

    return kernel


# ----------------------------------------------------------------------------
# Parameter init (PyTorch layouts) and one-time packing into kernel layouts.
# ----------------------------------------------------------------------------
def init_params(key, in_channels, h, w, num_actions):
    (h1, w1), (h2, w2), (h3, w3) = _spatial_shapes(h, w)
    n_flatten = DEPTHS[2] * h3 * w3

    def uniform(k, shape, fan_in):
        bound = 1.0 / np.sqrt(float(fan_in))
        return jax.random.uniform(k, shape, jnp.float32, -bound, bound)

    ks = jax.random.split(key, 10)
    return dict(
        c1_w=uniform(ks[0], (DEPTHS[0], in_channels, K1, K1), in_channels * K1 * K1),
        c1_b=uniform(ks[1], (DEPTHS[0],), in_channels * K1 * K1),
        c2_w=uniform(ks[2], (DEPTHS[1], DEPTHS[0], K2, K2), DEPTHS[0] * K2 * K2),
        c2_b=uniform(ks[3], (DEPTHS[1],), DEPTHS[0] * K2 * K2),
        c3_w=uniform(ks[4], (DEPTHS[2], DEPTHS[1], K3, K3), DEPTHS[1] * K3 * K3),
        c3_b=uniform(ks[5], (DEPTHS[2],), DEPTHS[1] * K3 * K3),
        fc1_w=uniform(ks[6], (FINAL, n_flatten), n_flatten),
        fc1_b=uniform(ks[7], (FINAL,), n_flatten),
        fc2_w=uniform(ks[8], (num_actions, FINAL), FINAL),
        fc2_b=uniform(ks[9], (num_actions,), FINAL),
    )


def pack_params(params, in_channels, h, w, num_actions):
    """One-time packing of torch-layout params into matmul-ready bf16 matrices."""
    C = in_channels
    C1, C2, C3 = DEPTHS
    (h1, w1), (h2, w2), (h3, w3) = _spatial_shapes(h, w)
    assert h1 % 2 == 0 and w1 % 2 == 0, "conv1 output spatial dims must be even"
    g = 2 * ST1                      # 8x8 super-pixel edge
    s3 = h3 * w3
    a_pad = ((num_actions + 127) // 128) * 128

    cw1 = np.asarray(params["c1_w"], np.float32)
    cb1 = np.asarray(params["c1_b"], np.float32)
    cw2 = np.asarray(params["c2_w"], np.float32)
    cb2 = np.asarray(params["c2_b"], np.float32)
    cw3 = np.asarray(params["c3_w"], np.float32)
    cb3 = np.asarray(params["c3_b"], np.float32)
    fw = np.asarray(params["fc1_w"], np.float32)
    fb = np.asarray(params["fc1_b"], np.float32)
    qw = np.asarray(params["fc2_w"], np.float32)
    qb = np.asarray(params["fc2_b"], np.float32)

    # conv1: K rows ordered (quad a, quad b, h8, w8, cin); N cols ordered
    # (parity p, parity q, cout).  Entries outside the 8x8 kernel window for
    # a given parity class are zero.
    w1cat = np.zeros((2, 2, g, g, C, 2, 2, C1), np.float32)
    for p in range(2):
        for q in range(2):
            for a in range(2):
                for h8 in range(g):
                    i = g * a + h8 - ST1 * p
                    if not 0 <= i < K1:
                        continue
                    for b in range(2):
                        for w8 in range(g):
                            j = g * b + w8 - ST1 * q
                            if not 0 <= j < K1:
                                continue
                            w1cat[a, b, h8, w8, :, p, q, :] = cw1[:, :, i, j].T
    w1p = w1cat.reshape(4 * g * g * C, 4 * C1)
    b1p = np.tile(cb1, 4).reshape(1, 4 * C1)

    w2p = cw2.transpose(2, 3, 1, 0).reshape(K2 * K2 * C1, C2)  # rows=(i2,j2,cin)
    b2p = cb2.reshape(1, C2)
    w3p = cw3.transpose(2, 3, 1, 0).reshape(K3 * K3 * C2, C3)  # rows=(i3,j3,cin)
    b3p = cb3.reshape(1, C3)

    # fc1: kernel flatten order is (spatial, channel); torch's is (channel, spatial).
    f1p = fw.reshape(FINAL, C3, s3).transpose(2, 1, 0).reshape(s3 * C3, FINAL)
    g1p = fb.reshape(1, FINAL)

    # fc2: transpose to (512, A) and zero-pad N to a lane-dense multiple of 128.
    f2p = np.zeros((FINAL, a_pad), np.float32)
    f2p[:, :num_actions] = qw.T
    g2p = np.zeros((1, a_pad), np.float32)
    g2p[0, :num_actions] = qb

    bf = lambda z: jnp.asarray(z, jnp.bfloat16)
    f32 = lambda z: jnp.asarray(z, jnp.float32)
    return dict(
        w1=bf(w1p), b1=f32(b1p), w2=bf(w2p), b2=f32(b2p), w3=bf(w3p), b3=f32(b3p),
        fw1=bf(f1p), fb1=f32(g1p), fw2=bf(f2p), fb2=f32(g2p),
        dims=(num_actions, a_pad),
    )


# ----------------------------------------------------------------------------
# Forward pass: one fused pallas_call (grid over batch, "parallel").
# ----------------------------------------------------------------------------
def network_forward(packed, x):
    """x: (B, C, H, W) float32 (NCHW) -> q_values: (B, num_actions) float32."""
    A, A_pad = packed["dims"]
    B, C, H, W = x.shape
    (H1, W1), (H2, W2), (H3, W3) = _spatial_shapes(H, W)
    g = 2 * ST1
    Gh, Gw = H1 // 2 + 1, W1 // 2 + 1
    spd = g * g * C

    # One-time input re-layout (single fused XLA copy, no duplication):
    # NCHW -> NHWC -> pad H,W to multiples of 8 -> 8x8xC super-pixel rows.
    xh = jnp.transpose(x, (0, 2, 3, 1))
    xh = jnp.pad(xh, ((0, 0), (0, Gh * g - H), (0, Gw * g - W), (0, 0)))
    xs = xh.reshape(B, Gh, g, Gw, g, C).transpose(0, 1, 3, 2, 4, 5)
    xs = xs.reshape(B, Gh * Gw, spd)

    kernel = _make_kernel(H1, W1, H2, W2, H3, W3, Gw)

    def _const(arr):
        return pl.BlockSpec(arr.shape, lambda b: (0,) * arr.ndim)

    out = pl.pallas_call(
        kernel,
        out_shape=jax.ShapeDtypeStruct((B, 1, A_pad), jnp.float32),
        grid=(B,),
        in_specs=[
            pl.BlockSpec((1, Gh * Gw, spd), lambda b: (b, 0, 0)),
            _const(packed["w1"]), _const(packed["b1"]),
            _const(packed["w2"]), _const(packed["b2"]),
            _const(packed["w3"]), _const(packed["b3"]),
            _const(packed["fw1"]), _const(packed["fb1"]),
            _const(packed["fw2"]), _const(packed["fb2"]),
        ],
        out_specs=pl.BlockSpec((1, 1, A_pad), lambda b: (b, 0, 0)),
        compiler_params=pltpu.CompilerParams(
            dimension_semantics=("parallel",)),
    )(xs, packed["w1"], packed["b1"], packed["w2"], packed["b2"],
      packed["w3"], packed["b3"], packed["fw1"], packed["fb1"],
      packed["fw2"], packed["fb2"])

    return out.reshape(B, A_pad)[:, :A]


# ----------------------------------------------------------------------------
# Pure-JAX/XLA reference of the PyTorch module (for correctness checking).
# ----------------------------------------------------------------------------
def reference_forward(params, x):
    hp = jax.lax.Precision.HIGHEST

    def conv(z, w, b, stride):
        z = jax.lax.conv_general_dilated(
            z, w, window_strides=(stride, stride), padding="VALID",
            dimension_numbers=("NCHW", "OIHW", "NCHW"), precision=hp)
        return jax.nn.relu(z + b[None, :, None, None])

    z = conv(x, params["c1_w"], params["c1_b"], ST1)
    z = conv(z, params["c2_w"], params["c2_b"], ST2)
    z = conv(z, params["c3_w"], params["c3_b"], ST3)
    f = z.reshape(z.shape[0], -1)
    h = jax.nn.relu(jnp.dot(f, params["fc1_w"].T, precision=hp) + params["fc1_b"])
    return jnp.dot(h, params["fc2_w"].T, precision=hp) + params["fc2_b"]


if __name__ == "__main__":
    # Smallest spatial size the 3-conv stack supports is 36 (-> 8 -> 3 -> 1).
    B, C, H, W = 2, 4, 36, 36
    NUM_ACTIONS = 6

    key = jax.random.PRNGKey(0)
    k_params, k_x = jax.random.split(key)
    params = init_params(k_params, C, H, W, NUM_ACTIONS)
    x = jax.random.uniform(k_x, (B, C, H, W), jnp.float32)

    packed = pack_params(params, C, H, W, NUM_ACTIONS)
    forward = jax.jit(functools.partial(network_forward, packed))

    q_values = forward(x)
    jax.block_until_ready(q_values)

    assert q_values.shape == (B, NUM_ACTIONS)
    assert q_values.dtype == jnp.float32

    # Validate against the f32 XLA reference (kernel runs bf16 on the MXU).
    q_ref = reference_forward(params, x)
    max_err = float(jnp.max(jnp.abs(q_values - q_ref)))
    assert jnp.allclose(q_values, q_ref, rtol=5e-2, atol=5e-2), max_err

    print("KERNEL_OK")
</pallas_src>

<mosaic_0001>
module attributes {stable_mosaic.version = 11 : i64} {
  func.func @kernel(%arg0: i32, %arg1: memref<1x25x256xf32, #tpu.memory_space<vmem>>, %arg2: memref<1024x128xbf16, #tpu.memory_space<vmem>>, %arg3: memref<1x128xf32, #tpu.memory_space<vmem>>, %arg4: memref<512x64xbf16, #tpu.memory_space<vmem>>, %arg5: memref<1x64xf32, #tpu.memory_space<vmem>>, %arg6: memref<576x64xbf16, #tpu.memory_space<vmem>>, %arg7: memref<1x64xf32, #tpu.memory_space<vmem>>, %arg8: memref<64x512xbf16, #tpu.memory_space<vmem>>, %arg9: memref<1x512xf32, #tpu.memory_space<vmem>>, %arg10: memref<512x128xbf16, #tpu.memory_space<vmem>>, %arg11: memref<1x128xf32, #tpu.memory_space<vmem>>, %arg12: memref<1x1x128xf32, #tpu.memory_space<vmem>>) attributes {dimension_semantics = [#tpu.dimension_semantics<parallel>], iteration_bounds = array<i64: 2>, scalar_prefetch = 0 : i64, scratch_operands = 0 : i64, tpu.core_type = #tpu.core_type<tc>, window_params = [{transform_indices = @transform_0, window_bounds = array<i64: 1, 25, 256>}, {pipeline_mode = #tpu.pipeline_mode<synchronous>, transform_indices = @transform_1, window_bounds = array<i64: 1024, 128>}, {pipeline_mode = #tpu.pipeline_mode<synchronous>, transform_indices = @transform_2, window_bounds = array<i64: 1, 128>}, {pipeline_mode = #tpu.pipeline_mode<synchronous>, transform_indices = @transform_3, window_bounds = array<i64: 512, 64>}, {pipeline_mode = #tpu.pipeline_mode<synchronous>, transform_indices = @transform_4, window_bounds = array<i64: 1, 64>}, {pipeline_mode = #tpu.pipeline_mode<synchronous>, transform_indices = @transform_5, window_bounds = array<i64: 576, 64>}, {pipeline_mode = #tpu.pipeline_mode<synchronous>, transform_indices = @transform_6, window_bounds = array<i64: 1, 64>}, {pipeline_mode = #tpu.pipeline_mode<synchronous>, transform_indices = @transform_7, window_bounds = array<i64: 64, 512>}, {pipeline_mode = #tpu.pipeline_mode<synchronous>, transform_indices = @transform_8, window_bounds = array<i64: 1, 512>}, {pipeline_mode = #tpu.pipeline_mode<synchronous>, transform_indices = @transform_9, window_bounds = array<i64: 512, 128>}, {pipeline_mode = #tpu.pipeline_mode<synchronous>, transform_indices = @transform_10, window_bounds = array<i64: 1, 128>}, {transform_indices = @transform_11, window_bounds = array<i64: 1, 1, 128>}]} {
    %c0 = arith.constant 0 : index
    %c0_0 = arith.constant 0 : index
    %c0_1 = arith.constant 0 : index
    %0 = vector.load %arg1[%c0, %c0_0, %c0_1] : memref<1x25x256xf32, #tpu.memory_space<vmem>>, vector<1x25x256xf32>
    %1 = vector.shape_cast %0 : vector<1x25x256xf32> to vector<25x256xf32>
    %2 = vector.extract_strided_slice %1 {offsets = [0, 0], sizes = [4, 256], strides = [1, 1]} : vector<25x256xf32> to vector<4x256xf32>
    %3 = vector.extract_strided_slice %1 {offsets = [5, 0], sizes = [4, 256], strides = [1, 1]} : vector<25x256xf32> to vector<4x256xf32>
    %4 = vector.extract_strided_slice %1 {offsets = [10, 0], sizes = [4, 256], strides = [1, 1]} : vector<25x256xf32> to vector<4x256xf32>
    %5 = vector.extract_strided_slice %1 {offsets = [15, 0], sizes = [4, 256], strides = [1, 1]} : vector<25x256xf32> to vector<4x256xf32>
    %6 = tpu.concatenate %2, %3, %4, %5 in 0 : vector<4x256xf32>, vector<4x256xf32>, vector<4x256xf32>, vector<4x256xf32> -> vector<16x256xf32>
    %7 = vector.extract_strided_slice %1 {offsets = [1, 0], sizes = [4, 256], strides = [1, 1]} : vector<25x256xf32> to vector<4x256xf32>
    %8 = vector.extract_strided_slice %1 {offsets = [6, 0], sizes = [4, 256], strides = [1, 1]} : vector<25x256xf32> to vector<4x256xf32>
    %9 = vector.extract_strided_slice %1 {offsets = [11, 0], sizes = [4, 256], strides = [1, 1]} : vector<25x256xf32> to vector<4x256xf32>
    %10 = vector.extract_strided_slice %1 {offsets = [16, 0], sizes = [4, 256], strides = [1, 1]} : vector<25x256xf32> to vector<4x256xf32>
    %11 = tpu.concatenate %7, %8, %9, %10 in 0 : vector<4x256xf32>, vector<4x256xf32>, vector<4x256xf32>, vector<4x256xf32> -> vector<16x256xf32>
    %12 = vector.extract_strided_slice %1 {offsets = [5, 0], sizes = [4, 256], strides = [1, 1]} : vector<25x256xf32> to vector<4x256xf32>
    %13 = vector.extract_strided_slice %1 {offsets = [10, 0], sizes = [4, 256], strides = [1, 1]} : vector<25x256xf32> to vector<4x256xf32>
    %14 = vector.extract_strided_slice %1 {offsets = [15, 0], sizes = [4, 256], strides = [1, 1]} : vector<25x256xf32> to vector<4x256xf32>
    %15 = vector.extract_strided_slice %1 {offsets = [20, 0], sizes = [4, 256], strides = [1, 1]} : vector<25x256xf32> to vector<4x256xf32>
    %16 = tpu.concatenate %12, %13, %14, %15 in 0 : vector<4x256xf32>, vector<4x256xf32>, vector<4x256xf32>, vector<4x256xf32> -> vector<16x256xf32>
    %17 = vector.extract_strided_slice %1 {offsets = [6, 0], sizes = [4, 256], strides = [1, 1]} : vector<25x256xf32> to vector<4x256xf32>
    %18 = vector.extract_strided_slice %1 {offsets = [11, 0], sizes = [4, 256], strides = [1, 1]} : vector<25x256xf32> to vector<4x256xf32>
    %19 = vector.extract_strided_slice %1 {offsets = [16, 0], sizes = [4, 256], strides = [1, 1]} : vector<25x256xf32> to vector<4x256xf32>
    %20 = vector.extract_strided_slice %1 {offsets = [21, 0], sizes = [4, 256], strides = [1, 1]} : vector<25x256xf32> to vector<4x256xf32>
    %21 = tpu.concatenate %17, %18, %19, %20 in 0 : vector<4x256xf32>, vector<4x256xf32>, vector<4x256xf32>, vector<4x256xf32> -> vector<16x256xf32>
    %22 = tpu.concatenate %6, %11, %16, %21 in 1 : vector<16x256xf32>, vector<16x256xf32>, vector<16x256xf32>, vector<16x256xf32> -> vector<16x1024xf32>
    %23 = arith.truncf %22 : vector<16x1024xf32> to vector<16x1024xbf16>
    %c0_2 = arith.constant 0 : index
    %c0_3 = arith.constant 0 : index
    %24 = vector.load %arg2[%c0_2, %c0_3] : memref<1024x128xbf16, #tpu.memory_space<vmem>>, vector<1024x128xbf16>
    %cst = arith.constant dense<0.000000e+00> : vector<16x128xf32>
    %25 = tpu.matmul %23, %24, %cst {dimension_numbers = #tpu.dot_dimension_numbers<[1], [0], [0], [1], [0, 0, 1, 1], [], []>} : vector<16x1024xbf16>, vector<1024x128xbf16>, vector<16x128xf32> -> vector<16x128xf32>
    %c0_4 = arith.constant 0 : index
    %c0_5 = arith.constant 0 : index
    %26 = vector.load %arg3[%c0_4, %c0_5] : memref<1x128xf32, #tpu.memory_space<vmem>>, vector<1x128xf32>
    %27 = vector.broadcast %26 : vector<1x128xf32> to vector<16x128xf32>
    %28 = arith.addf %25, %27 : vector<16x128xf32>
    %cst_6 = arith.constant 0.000000e+00 : f32
    %29 = vector.broadcast %cst_6 : f32 to vector<16x128xf32>
    %30 = arith.maximumf %28, %29 : vector<16x128xf32>
    %31 = vector.extract_strided_slice %30 {offsets = [0, 0], sizes = [3, 32], strides = [1, 1]} : vector<16x128xf32> to vector<3x32xf32>
    %32 = vector.extract_strided_slice %30 {offsets = [4, 0], sizes = [3, 32], strides = [1, 1]} : vector<16x128xf32> to vector<3x32xf32>
    %33 = vector.extract_strided_slice %30 {offsets = [8, 0], sizes = [3, 32], strides = [1, 1]} : vector<16x128xf32> to vector<3x32xf32>
    %34 = tpu.concatenate %31, %32, %33 in 0 : vector<3x32xf32>, vector<3x32xf32>, vector<3x32xf32> -> vector<9x32xf32>
    %35 = vector.extract_strided_slice %30 {offsets = [0, 32], sizes = [3, 32], strides = [1, 1]} : vector<16x128xf32> to vector<3x32xf32>
    %36 = vector.extract_strided_slice %30 {offsets = [4, 32], sizes = [3, 32], strides = [1, 1]} : vector<16x128xf32> to vector<3x32xf32>
    %37 = vector.extract_strided_slice %30 {offsets = [8, 32], sizes = [3, 32], strides = [1, 1]} : vector<16x128xf32> to vector<3x32xf32>
    %38 = tpu.concatenate %35, %36, %37 in 0 : vector<3x32xf32>, vector<3x32xf32>, vector<3x32xf32> -> vector<9x32xf32>
    %39 = vector.extract_strided_slice %30 {offsets = [1, 0], sizes = [3, 32], strides = [1, 1]} : vector<16x128xf32> to vector<3x32xf32>
    %40 = vector.extract_strided_slice %30 {offsets = [5, 0], sizes = [3, 32], strides = [1, 1]} : vector<16x128xf32> to vector<3x32xf32>
    %41 = vector.extract_strided_slice %30 {offsets = [9, 0], sizes = [3, 32], strides = [1, 1]} : vector<16x128xf32> to vector<3x32xf32>
    %42 = tpu.concatenate %39, %40, %41 in 0 : vector<3x32xf32>, vector<3x32xf32>, vector<3x32xf32> -> vector<9x32xf32>
    %43 = vector.extract_strided_slice %30 {offsets = [1, 32], sizes = [3, 32], strides = [1, 1]} : vector<16x128xf32> to vector<3x32xf32>
    %44 = vector.extract_strided_slice %30 {offsets = [5, 32], sizes = [3, 32], strides = [1, 1]} : vector<16x128xf32> to vector<3x32xf32>
    %45 = vector.extract_strided_slice %30 {offsets = [9, 32], sizes = [3, 32], strides = [1, 1]} : vector<16x128xf32> to vector<3x32xf32>
    %46 = tpu.concatenate %43, %44, %45 in 0 : vector<3x32xf32>, vector<3x32xf32>, vector<3x32xf32> -> vector<9x32xf32>
    %47 = vector.extract_strided_slice %30 {offsets = [0, 64], sizes = [3, 32], strides = [1, 1]} : vector<16x128xf32> to vector<3x32xf32>
    %48 = vector.extract_strided_slice %30 {offsets = [4, 64], sizes = [3, 32], strides = [1, 1]} : vector<16x128xf32> to vector<3x32xf32>
    %49 = vector.extract_strided_slice %30 {offsets = [8, 64], sizes = [3, 32], strides = [1, 1]} : vector<16x128xf32> to vector<3x32xf32>
    %50 = tpu.concatenate %47, %48, %49 in 0 : vector<3x32xf32>, vector<3x32xf32>, vector<3x32xf32> -> vector<9x32xf32>
    %51 = vector.extract_strided_slice %30 {offsets = [0, 96], sizes = [3, 32], strides = [1, 1]} : vector<16x128xf32> to vector<3x32xf32>
    %52 = vector.extract_strided_slice %30 {offsets = [4, 96], sizes = [3, 32], strides = [1, 1]} : vector<16x128xf32> to vector<3x32xf32>
    %53 = vector.extract_strided_slice %30 {offsets = [8, 96], sizes = [3, 32], strides = [1, 1]} : vector<16x128xf32> to vector<3x32xf32>
    %54 = tpu.concatenate %51, %52, %53 in 0 : vector<3x32xf32>, vector<3x32xf32>, vector<3x32xf32> -> vector<9x32xf32>
    %55 = vector.extract_strided_slice %30 {offsets = [1, 64], sizes = [3, 32], strides = [1, 1]} : vector<16x128xf32> to vector<3x32xf32>
    %56 = vector.extract_strided_slice %30 {offsets = [5, 64], sizes = [3, 32], strides = [1, 1]} : vector<16x128xf32> to vector<3x32xf32>
    %57 = vector.extract_strided_slice %30 {offsets = [9, 64], sizes = [3, 32], strides = [1, 1]} : vector<16x128xf32> to vector<3x32xf32>
    %58 = tpu.concatenate %55, %56, %57 in 0 : vector<3x32xf32>, vector<3x32xf32>, vector<3x32xf32> -> vector<9x32xf32>
    %59 = vector.extract_strided_slice %30 {offsets = [1, 96], sizes = [3, 32], strides = [1, 1]} : vector<16x128xf32> to vector<3x32xf32>
    %60 = vector.extract_strided_slice %30 {offsets = [5, 96], sizes = [3, 32], strides = [1, 1]} : vector<16x128xf32> to vector<3x32xf32>
    %61 = vector.extract_strided_slice %30 {offsets = [9, 96], sizes = [3, 32], strides = [1, 1]} : vector<16x128xf32> to vector<3x32xf32>
    %62 = tpu.concatenate %59, %60, %61 in 0 : vector<3x32xf32>, vector<3x32xf32>, vector<3x32xf32> -> vector<9x32xf32>
    %63 = vector.extract_strided_slice %30 {offsets = [4, 0], sizes = [3, 32], strides = [1, 1]} : vector<16x128xf32> to vector<3x32xf32>
    %64 = vector.extract_strided_slice %30 {offsets = [8, 0], sizes = [3, 32], strides = [1, 1]} : vector<16x128xf32> to vector<3x32xf32>
    %65 = vector.extract_strided_slice %30 {offsets = [12, 0], sizes = [3, 32], strides = [1, 1]} : vector<16x128xf32> to vector<3x32xf32>
    %66 = tpu.concatenate %63, %64, %65 in 0 : vector<3x32xf32>, vector<3x32xf32>, vector<3x32xf32> -> vector<9x32xf32>
    %67 = vector.extract_strided_slice %30 {offsets = [4, 32], sizes = [3, 32], strides = [1, 1]} : vector<16x128xf32> to vector<3x32xf32>
    %68 = vector.extract_strided_slice %30 {offsets = [8, 32], sizes = [3, 32], strides = [1, 1]} : vector<16x128xf32> to vector<3x32xf32>
    %69 = vector.extract_strided_slice %30 {offsets = [12, 32], sizes = [3, 32], strides = [1, 1]} : vector<16x128xf32> to vector<3x32xf32>
    %70 = tpu.concatenate %67, %68, %69 in 0 : vector<3x32xf32>, vector<3x32xf32>, vector<3x32xf32> -> vector<9x32xf32>
    %71 = vector.extract_strided_slice %30 {offsets = [5, 0], sizes = [3, 32], strides = [1, 1]} : vector<16x128xf32> to vector<3x32xf32>
    %72 = vector.extract_strided_slice %30 {offsets = [9, 0], sizes = [3, 32], strides = [1, 1]} : vector<16x128xf32> to vector<3x32xf32>
    %73 = vector.extract_strided_slice %30 {offsets = [13, 0], sizes = [3, 32], strides = [1, 1]} : vector<16x128xf32> to vector<3x32xf32>
    %74 = tpu.concatenate %71, %72, %73 in 0 : vector<3x32xf32>, vector<3x32xf32>, vector<3x32xf32> -> vector<9x32xf32>
    %75 = vector.extract_strided_slice %30 {offsets = [5, 32], sizes = [3, 32], strides = [1, 1]} : vector<16x128xf32> to vector<3x32xf32>
    %76 = vector.extract_strided_slice %30 {offsets = [9, 32], sizes = [3, 32], strides = [1, 1]} : vector<16x128xf32> to vector<3x32xf32>
    %77 = vector.extract_strided_slice %30 {offsets = [13, 32], sizes = [3, 32], strides = [1, 1]} : vector<16x128xf32> to vector<3x32xf32>
    %78 = tpu.concatenate %75, %76, %77 in 0 : vector<3x32xf32>, vector<3x32xf32>, vector<3x32xf32> -> vector<9x32xf32>
    %79 = vector.extract_strided_slice %30 {offsets = [4, 64], sizes = [3, 32], strides = [1, 1]} : vector<16x128xf32> to vector<3x32xf32>
    %80 = vector.extract_strided_slice %30 {offsets = [8, 64], sizes = [3, 32], strides = [1, 1]} : vector<16x128xf32> to vector<3x32xf32>
    %81 = vector.extract_strided_slice %30 {offsets = [12, 64], sizes = [3, 32], strides = [1, 1]} : vector<16x128xf32> to vector<3x32xf32>
    %82 = tpu.concatenate %79, %80, %81 in 0 : vector<3x32xf32>, vector<3x32xf32>, vector<3x32xf32> -> vector<9x32xf32>
    %83 = vector.extract_strided_slice %30 {offsets = [4, 96], sizes = [3, 32], strides = [1, 1]} : vector<16x128xf32> to vector<3x32xf32>
    %84 = vector.extract_strided_slice %30 {offsets = [8, 96], sizes = [3, 32], strides = [1, 1]} : vector<16x128xf32> to vector<3x32xf32>
    %85 = vector.extract_strided_slice %30 {offsets = [12, 96], sizes = [3, 32], strides = [1, 1]} : vector<16x128xf32> to vector<3x32xf32>
    %86 = tpu.concatenate %83, %84, %85 in 0 : vector<3x32xf32>, vector<3x32xf32>, vector<3x32xf32> -> vector<9x32xf32>
    %87 = vector.extract_strided_slice %30 {offsets = [5, 64], sizes = [3, 32], strides = [1, 1]} : vector<16x128xf32> to vector<3x32xf32>
    %88 = vector.extract_strided_slice %30 {offsets = [9, 64], sizes = [3, 32], strides = [1, 1]} : vector<16x128xf32> to vector<3x32xf32>
    %89 = vector.extract_strided_slice %30 {offsets = [13, 64], sizes = [3, 32], strides = [1, 1]} : vector<16x128xf32> to vector<3x32xf32>
    %90 = tpu.concatenate %87, %88, %89 in 0 : vector<3x32xf32>, vector<3x32xf32>, vector<3x32xf32> -> vector<9x32xf32>
    %91 = vector.extract_strided_slice %30 {offsets = [5, 96], sizes = [3, 32], strides = [1, 1]} : vector<16x128xf32> to vector<3x32xf32>
    %92 = vector.extract_strided_slice %30 {offsets = [9, 96], sizes = [3, 32], strides = [1, 1]} : vector<16x128xf32> to vector<3x32xf32>
    %93 = vector.extract_strided_slice %30 {offsets = [13, 96], sizes = [3, 32], strides = [1, 1]} : vector<16x128xf32> to vector<3x32xf32>
    %94 = tpu.concatenate %91, %92, %93 in 0 : vector<3x32xf32>, vector<3x32xf32>, vector<3x32xf32> -> vector<9x32xf32>
    %95 = tpu.concatenate %34, %38, %42, %46, %50, %54, %58, %62, %66, %70, %74, %78, %82, %86, %90, %94 in 1 : vector<9x32xf32>, vector<9x32xf32>, vector<9x32xf32>, vector<9x32xf32>, vector<9x32xf32>, vector<9x32xf32>, vector<9x32xf32>, vector<9x32xf32>, vector<9x32xf32>, vector<9x32xf32>, vector<9x32xf32>, vector<9x32xf32>, vector<9x32xf32>, vector<9x32xf32>, vector<9x32xf32>, vector<9x32xf32> -> vector<9x512xf32>
    %96 = arith.truncf %95 : vector<9x512xf32> to vector<9x512xbf16>
    %c0_7 = arith.constant 0 : index
    %c0_8 = arith.constant 0 : index
    %97 = vector.load %arg4[%c0_7, %c0_8] : memref<512x64xbf16, #tpu.memory_space<vmem>>, vector<512x64xbf16>
    %cst_9 = arith.constant dense<0.000000e+00> : vector<9x64xf32>
    %98 = tpu.matmul %96, %97, %cst_9 {dimension_numbers = #tpu.dot_dimension_numbers<[1], [0], [0], [1], [0, 0, 1, 1], [], []>} : vector<9x512xbf16>, vector<512x64xbf16>, vector<9x64xf32> -> vector<9x64xf32>
    %c0_10 = arith.constant 0 : index
    %c0_11 = arith.constant 0 : index
    %99 = vector.load %arg5[%c0_10, %c0_11] : memref<1x64xf32, #tpu.memory_space<vmem>>, vector<1x64xf32>
    %100 = vector.broadcast %99 : vector<1x64xf32> to vector<9x64xf32>
    %101 = arith.addf %98, %100 : vector<9x64xf32>
    %cst_12 = arith.constant 0.000000e+00 : f32
    %102 = vector.broadcast %cst_12 : f32 to vector<9x64xf32>
    %103 = arith.maximumf %101, %102 : vector<9x64xf32>
    %104 = vector.extract_strided_slice %103 {offsets = [0, 0], sizes = [1, 64], strides = [1, 1]} : vector<9x64xf32> to vector<1x64xf32>
    %105 = vector.extract_strided_slice %103 {offsets = [1, 0], sizes = [1, 64], strides = [1, 1]} : vector<9x64xf32> to vector<1x64xf32>
    %106 = vector.extract_strided_slice %103 {offsets = [2, 0], sizes = [1, 64], strides = [1, 1]} : vector<9x64xf32> to vector<1x64xf32>
    %107 = vector.extract_strided_slice %103 {offsets = [3, 0], sizes = [1, 64], strides = [1, 1]} : vector<9x64xf32> to vector<1x64xf32>
    %108 = vector.extract_strided_slice %103 {offsets = [4, 0], sizes = [1, 64], strides = [1, 1]} : vector<9x64xf32> to vector<1x64xf32>
    %109 = vector.extract_strided_slice %103 {offsets = [5, 0], sizes = [1, 64], strides = [1, 1]} : vector<9x64xf32> to vector<1x64xf32>
    %110 = vector.extract_strided_slice %103 {offsets = [6, 0], sizes = [1, 64], strides = [1, 1]} : vector<9x64xf32> to vector<1x64xf32>
    %111 = vector.extract_strided_slice %103 {offsets = [7, 0], sizes = [1, 64], strides = [1, 1]} : vector<9x64xf32> to vector<1x64xf32>
    %112 = vector.extract_strided_slice %103 {offsets = [8, 0], sizes = [1, 64], strides = [1, 1]} : vector<9x64xf32> to vector<1x64xf32>
    %113 = tpu.concatenate %104, %105, %106, %107, %108, %109, %110, %111, %112 in 1 : vector<1x64xf32>, vector<1x64xf32>, vector<1x64xf32>, vector<1x64xf32>, vector<1x64xf32>, vector<1x64xf32>, vector<1x64xf32>, vector<1x64xf32>, vector<1x64xf32> -> vector<1x576xf32>
    %114 = arith.truncf %113 : vector<1x576xf32> to vector<1x576xbf16>
    %c0_13 = arith.constant 0 : index
    %c0_14 = arith.constant 0 : index
    %115 = vector.load %arg6[%c0_13, %c0_14] : memref<576x64xbf16, #tpu.memory_space<vmem>>, vector<576x64xbf16>
    %cst_15 = arith.constant dense<0.000000e+00> : vector<1x64xf32>
    %116 = tpu.matmul %114, %115, %cst_15 {dimension_numbers = #tpu.dot_dimension_numbers<[1], [0], [0], [1], [0, 0, 1, 1], [], []>} : vector<1x576xbf16>, vector<576x64xbf16>, vector<1x64xf32> -> vector<1x64xf32>
    %c0_16 = arith.constant 0 : index
    %c0_17 = arith.constant 0 : index
    %117 = vector.load %arg7[%c0_16, %c0_17] : memref<1x64xf32, #tpu.memory_space<vmem>>, vector<1x64xf32>
    %118 = arith.addf %116, %117 : vector<1x64xf32>
    %cst_18 = arith.constant 0.000000e+00 : f32
    %119 = vector.broadcast %cst_18 : f32 to vector<1x64xf32>
    %120 = arith.maximumf %118, %119 : vector<1x64xf32>
    %c0_19 = arith.constant 0 : index
    %c0_20 = arith.constant 0 : index
    %121 = vector.load %arg9[%c0_19, %c0_20] : memref<1x512xf32, #tpu.memory_space<vmem>>, vector<1x512xf32>
    %122 = arith.truncf %120 : vector<1x64xf32> to vector<1x64xbf16>
    %c0_21 = arith.constant 0 : index
    %c0_22 = arith.constant 0 : index
    %123 = vector.load %arg8[%c0_21, %c0_22] : memref<64x512xbf16, #tpu.memory_space<vmem>>, vector<64x512xbf16>
    %cst_23 = arith.constant dense<0.000000e+00> : vector<1x512xf32>
    %124 = tpu.matmul %122, %123, %cst_23 {dimension_numbers = #tpu.dot_dimension_numbers<[1], [0], [0], [1], [0, 0, 1, 1], [], []>} : vector<1x64xbf16>, vector<64x512xbf16>, vector<1x512xf32> -> vector<1x512xf32>
    %125 = arith.addf %121, %124 : vector<1x512xf32>
    %cst_24 = arith.constant 0.000000e+00 : f32
    %126 = vector.broadcast %cst_24 : f32 to vector<1x512xf32>
    %127 = arith.maximumf %125, %126 : vector<1x512xf32>
    %128 = arith.truncf %127 : vector<1x512xf32> to vector<1x512xbf16>
    %c0_25 = arith.constant 0 : index
    %c0_26 = arith.constant 0 : index
    %129 = vector.load %arg10[%c0_25, %c0_26] : memref<512x128xbf16, #tpu.memory_space<vmem>>, vector<512x128xbf16>
    %cst_27 = arith.constant dense<0.000000e+00> : vector<1x128xf32>
    %130 = tpu.matmul %128, %129, %cst_27 {dimension_numbers = #tpu.dot_dimension_numbers<[1], [0], [0], [1], [0, 0, 1, 1], [], []>} : vector<1x512xbf16>, vector<512x128xbf16>, vector<1x128xf32> -> vector<1x128xf32>
    %c0_28 = arith.constant 0 : index
    %c0_29 = arith.constant 0 : index
    %131 = vector.load %arg11[%c0_28, %c0_29] : memref<1x128xf32, #tpu.memory_space<vmem>>, vector<1x128xf32>
    %132 = arith.addf %130, %131 : vector<1x128xf32>
    %c0_30 = arith.constant 0 : index
    %c0_31 = arith.constant 0 : index
    %c0_32 = arith.constant 0 : index
    %133 = vector.load %arg12[%c0_30, %c0_31, %c0_32] : memref<1x1x128xf32, #tpu.memory_space<vmem>>, vector<1x1x128xf32>
    %134 = vector.shape_cast %133 : vector<1x1x128xf32> to vector<1x128xf32>
    %135 = vector.shape_cast %132 : vector<1x128xf32> to vector<1x1x128xf32>
    tpu.vector_store %arg12[%c0_30, %c0_31, %c0_32], %135 {strides = array<i32>} : memref<1x1x128xf32, #tpu.memory_space<vmem>>, vector<1x1x128xf32>,
    return
  }
  func.func @transform_0(%arg0: i32) -> (i32, i32, i32) {
    %c0_i32 = arith.constant 0 : i32
    %c0_i32_0 = arith.constant 0 : i32
    %c0_i32_1 = arith.constant 0 : i32
    return %arg0, %c0_i32, %c0_i32_0 : i32, i32, i32
  }
  func.func @transform_1(%arg0: i32) -> (i32, i32) {
    %c0_i32 = arith.constant 0 : i32
    %c0_i32_0 = arith.constant 0 : i32
    %c0_i32_1 = arith.constant 0 : i32
    return %c0_i32, %c0_i32_0 : i32, i32
  }
  func.func @transform_2(%arg0: i32) -> (i32, i32) {
    %c0_i32 = arith.constant 0 : i32
    %c0_i32_0 = arith.constant 0 : i32
    %c0_i32_1 = arith.constant 0 : i32
    return %c0_i32, %c0_i32_0 : i32, i32
  }
  func.func @transform_3(%arg0: i32) -> (i32, i32) {
    %c0_i32 = arith.constant 0 : i32
    %c0_i32_0 = arith.constant 0 : i32
    %c0_i32_1 = arith.constant 0 : i32
    return %c0_i32, %c0_i32_0 : i32, i32
  }
  func.func @transform_4(%arg0: i32) -> (i32, i32) {
    %c0_i32 = arith.constant 0 : i32
    %c0_i32_0 = arith.constant 0 : i32
    %c0_i32_1 = arith.constant 0 : i32
    return %c0_i32, %c0_i32_0 : i32, i32
  }
  func.func @transform_5(%arg0: i32) -> (i32, i32) {
    %c0_i32 = arith.constant 0 : i32
    %c0_i32_0 = arith.constant 0 : i32
    %c0_i32_1 = arith.constant 0 : i32
    return %c0_i32, %c0_i32_0 : i32, i32
  }
  func.func @transform_6(%arg0: i32) -> (i32, i32) {
    %c0_i32 = arith.constant 0 : i32
    %c0_i32_0 = arith.constant 0 : i32
    %c0_i32_1 = arith.constant 0 : i32
    return %c0_i32, %c0_i32_0 : i32, i32
  }
  func.func @transform_7(%arg0: i32) -> (i32, i32) {
    %c0_i32 = arith.constant 0 : i32
    %c0_i32_0 = arith.constant 0 : i32
    %c0_i32_1 = arith.constant 0 : i32
    return %c0_i32, %c0_i32_0 : i32, i32
  }
  func.func @transform_8(%arg0: i32) -> (i32, i32) {
    %c0_i32 = arith.constant 0 : i32
    %c0_i32_0 = arith.constant 0 : i32
    %c0_i32_1 = arith.constant 0 : i32
    return %c0_i32, %c0_i32_0 : i32, i32
  }
  func.func @transform_9(%arg0: i32) -> (i32, i32) {
    %c0_i32 = arith.constant 0 : i32
    %c0_i32_0 = arith.constant 0 : i32
    %c0_i32_1 = arith.constant 0 : i32
    return %c0_i32, %c0_i32_0 : i32, i32
  }
  func.func @transform_10(%arg0: i32) -> (i32, i32) {
    %c0_i32 = arith.constant 0 : i32
    %c0_i32_0 = arith.constant 0 : i32
    %c0_i32_1 = arith.constant 0 : i32
    return %c0_i32, %c0_i32_0 : i32, i32
  }
  func.func @transform_11(%arg0: i32) -> (i32, i32, i32) {
    %c0_i32 = arith.constant 0 : i32
    %c0_i32_0 = arith.constant 0 : i32
    %c0_i32_1 = arith.constant 0 : i32
    return %arg0, %c0_i32, %c0_i32_0 : i32, i32, i32
  }
}

</mosaic_0001>

<bundles_post_ra>
// kernel: network_forward.1
= control target key start
LH: loop header
LB: loop body
LE: loop exit
PB: predicated region body
PF: predicated region fallthrough
CT: control target
= control target key end

     0   :  { %16 = vsyncpa [#allocation3], 0  ;;  %s4295_s0 = inlined_call_operand.vmem [shape: f32[2,25,256], index: 0, kind: input, shape index: {}]   ;;  %s4296_s1 = inlined_call_operand.vmem [shape: bf16[1024,128], index: 1, kind: input, shape index: {}]   ;;  %s4297_s2 = inlined_call_operand.vmem [shape: f32[1,128], index: 2, kind: input, shape index: {}]   ;;  %s4298_s3 = inlined_call_operand.vmem [shape: bf16[512,64], index: 3, kind: input, shape index: {}]   ;;  %s4299_s4 = inlined_call_operand.vmem [shape: f32[1,64], index: 4, kind: input, shape index: {}]   ;;  %s4300_s5 = inlined_call_operand.vmem [shape: bf16[576,64], index: 5, kind: input, shape index: {}]   ;;  %s4301_s6 = inlined_call_operand.vmem [shape: f32[1,64], index: 6, kind: input, shape index: {}]   ;;  %s4302_s7 = inlined_call_operand.vmem [shape: bf16[64,512], index: 7, kind: input, shape index: {}]   ;;  %s4303_s8 = inlined_call_operand.vmem [shape: f32[1,512], index: 8, kind: input, shape index: {}]   ;;  %s4304_s9 = inlined_call_operand.vmem [shape: bf16[512,128], index: 9, kind: input, shape index: {}]   ;;  %s4305_s10 = inlined_call_operand.vmem [shape: f32[1,128], index: 10, kind: input, shape index: {}]   ;;  %s4306_s11 = inlined_call_operand.hbm [shape: f32[2,1,128], index: 11, kind: output, shape index: {}]  }
   0x1   :  { %18 = vsyncpa [#allocation3 + $0x1], 0  ;;  %s3524_s17 = smov 0   ;;  %s3526_s18 = smov 0  }
   0x2   :  { %s3528_s19 = smov 0   ;;  %s3530_s20 = smov 0  }
   0x3 LB: > { %4308 = sst [smem:[#allocation5_spill]] %s3452_s19  ;;  %s3545_s21 = sadd.s32 4294967295, %s3456_s20   ;;  %s3456_s20 = sphi %s3530_s20, %s4316_s20   ;;  %s3452_s19 = sphi %s3528_s19, %s4313_s19   ;;  %s3448_s18 = sphi %s3526_s18, %s4315_s18   ;;  %s3444_s17 = sphi %s3524_s17, %s4314_s17  }
   0x4   : > { %s2702_s22 = sadd.s32 4294967294, %s3456_s20   ;;  %s3549_s23 = sadd.s32 1, %s3456_s20  }
   0x5   : > { %s267_s24 = sadd.s32 1, %s3452_s19  ;;  %s264_s25 = ssub.s32 %s3456_s20, %s3549_s23 }
   0x6   : > { %p277_p0 = scmp.ne.s32.totalorder %s3452_s19, %s3448_s18  ;;  %p265_p1 = scmp.eq.s32.totalorder %s264_s25, 0 }
   0x7   : > { %p278_p2 = scmp.eq.s32.totalorder %s3545_s21, 1  ;;  %p283_p3 = scmp.ne.s32.totalorder %s3448_s18, %s3444_s17 }
   0x8   : > { %p284_p4 = scmp.eq.s32.totalorder %s2702_s22, 1  ;;  %p2705_p7 = scmp.ge.s32.totalorder %s3456_s20, 1 }
   0x9   : > { %s3560_s26 = scalar_select %p265_p1, %s3452_s19, %s267_s24  }
   0xa   : > { %p3562_p5 = por %p278_p2, %p277_p0  ;;  %p3566_p6 = por %p284_p4, %p283_p3 }
   0xb   : > { %4309 = sst [smem:[#allocation6_spill]] %s3560_s26  ;;  %p340_p8 = scmp.lt.s32.totalorder %s3456_s20, 3 }
   0xd   : > { %p341_p9 = pnand %p2705_p7, %p340_p8 }
   0xe   : > { %p379_p10 = scmp.lt.s32.totalorder (!%p341_p9), %s3545_s21, 1  ;;  %s3458_s25 = smov (!%p341_p9), 64  }
   0xf   : > { %344 = sbr.rel (%p341_p9) target bundleno = 1392 (0x570), region = 64  ;;  %s2893_s12 = sshll.u32 (!%p341_p9), %s3545_s21, 4 }
  0x10   : > { %s2645_s22 = scalar_lea.hbm (!%p341_p9), %s4306_s11, %s2893_s12 }
  0x14   : > { %v3208_v0 = vld [vmem:[%s4296_s1 + $0x78] sm:$0xff]   ;;  %v3212_v4 = vld [vmem:[%s4296_s1 + $0x70] sm:$0xff]   ;;  %v3216_v8 = vld [vmem:[%s4296_s1 + $0x68] sm:$0xff]   ;;  %s380_s16 = scalar_select %p379_p10, %s3545_s21, 1  ;;  %vm397_vm0 = vcmask 1046528   ;;  %vm412_vm1 = vcmask 1044480  }
  0x15   : > { %v3209_v1 = vld [vmem:[%s4296_s1 + $0xf8] sm:$0xff]   ;;  %2897 = vmatprep.subr.bf16.mxu0 %v3208_v0  ;;  %v3213_v5 = vld [vmem:[%s4296_s1 + $0xf0] sm:$0xff]   ;;  %v3217_v9 = vld [vmem:[%s4296_s1 + $0xe8] sm:$0xff]   ;;  %vm421_vm2 = vcmask 1043456   ;;  %vm428_vm3 = vcmask 1045504   ;;  %vm445_vm4 = vcmask 1042432  }
  0x16   : > { %v3210_v2 = vld [vmem:[%s4296_s1 + $0x38] sm:$0xff]   ;;  %2919 = vmatprep.subr.bf16.mxu1 %v3209_v1  ;;  %v3214_v6 = vld [vmem:[%s4296_s1 + $0x30] sm:$0xff]   ;;  %v3218_v10 = vld [vmem:[%s4296_s1 + $0x28] sm:$0xff]   ;;  %s2896_s15 = sshll.u32 %s380_s16, 6  ;;  %vm458_vm5 = vcmask 1040384   ;;  %vm471_vm6 = vcmask 1041408  }
  0x17   : > { %v3211_v3 = vld [vmem:[%s4296_s1 + $0xb8] sm:$0xff]   ;;  %2898 = vmatpush3.bf16.msra.mxu0 %v3210_v2  ;;  %v3215_v7 = vld [vmem:[%s4296_s1 + $0xb0] sm:$0xff]   ;;  %v3219_v11 = vld [vmem:[%s4296_s1 + $0xa8] sm:$0xff]   ;;  %s3667_s13 = scalar_lea.vmem %s4295_s0, %s2896_s15  ;;  %vm1243_vm7 = vcmask 523264   ;;  %vm1246_vm8 = vcmask 785408   ;;  %vm3460_vm9 = vmmov 0  }
  0x18   : > { %2920 = vmatpush3.bf16.msra.mxu1 %v3211_v3  ;;  %2899 = vmatprep.subr.bf16.mxu0 %v3212_v4  ;;  %v3220_v12 = vld [vmem:[%s4296_s1 + $0x60] sm:$0xff]   ;;  %v3224_v16 = vld [vmem:[%s4296_s1 + $0x58] sm:$0xff]   ;;  %v3228_v20 = vld [vmem:[%s4296_s1 + $0x50] sm:$0xff]   ;;  %s3463_s21 = smov [#allocation2]  }
  0x19   : > { %2921 = vmatprep.subr.bf16.mxu1 %v3213_v5  ;;  %v3221_v13 = vld [vmem:[%s4296_s1 + $0xe0] sm:$0xff]   ;;  %v3225_v17 = vld [vmem:[%s4296_s1 + $0xd8] sm:$0xff]   ;;  %v3229_v21 = vld [vmem:[%s4296_s1 + $0xd0] sm:$0xff]   ;;  %s3400_s24 = sshll.u32 %s3463_s21, 4  ;;  %s3401_s24 = int_to_ptr.vmem [resolvable:$false] %s3400_s24 }
  0x1a   : > { %v3222_v14 = vld [vmem:[%s4296_s1 + $0x20] sm:$0xff]   ;;  %v3226_v18 = vld [vmem:[%s4296_s1 + $0x18] sm:$0xff]   ;;  %v3230_v22 = vld [vmem:[%s4296_s1 + $0x10] sm:$0xff]   ;;  %s3402_s29 = scalar_lea.vmem %s3401_s24, 32 }
  0x1b   : > { %2900 = vmatpush3.bf16.msra.mxu0 %v3214_v6  ;;  %v3223_v15 = vld [vmem:[%s4296_s1 + $0xa0] sm:$0xff]   ;;  %v3227_v19 = vld [vmem:[%s4296_s1 + $0x98] sm:$0xff]   ;;  %v3231_v23 = vld [vmem:[%s4296_s1 + $0x90] sm:$0xff]  }
  0x1c   : > { %2922 = vmatpush3.bf16.msra.mxu1 %v3215_v7  ;;  %2901 = vmatprep.subr.bf16.mxu0 %v3216_v8  ;;  %v3232_v24 = vld [vmem:[%s4296_s1 + $0x48] sm:$0xff]   ;;  %v3236_v28 = vld [vmem:[%s4296_s1 + $0x40] sm:$0xff]   ;;  %v3679_v33 = vld [vmem:[%s3667_s13 + $0x18] sm:$0xff] }
  0x1d   : > { %2923 = vmatprep.subr.bf16.mxu1 %v3217_v9  ;;  %v3233_v25 = vld [vmem:[%s4296_s1 + $0xc8] sm:$0xff]   ;;  %v3237_v29 = vld [vmem:[%s4296_s1 + $0xc0] sm:$0xff]   ;;  %v402_v36 = vrot.slane %v3679_v33, 1  ;;  %v407_v37 = vrot.slane %v3679_v33, 2  ;;  %v416_v38 = vrot.slane %v3679_v33, 3  ;;  %v3692_v40 = vld [vmem:[%s3667_s13 + $0x10] sm:$0xff] }
  0x1e   : > { %v3234_v26 = vld [vmem:[%s4296_s1 + $0x8] sm:$0xff]   ;;  %v3238_v30 = vld [vmem:[%s4296_s1] sm:$0xff]   ;;  %v3240_v46 = vld [vmem:[%s4296_s1 + $0x178] sm:$0xff]   ;;  %v399_v48 = vrot.slane %v3692_v40, 1  ;;  %v406_v49 = vrot.slane %v3692_v40, 2  ;;  %v413_v50 = vrot.slane %v3692_v40, 3 }
  0x1f   : > { %2902 = vmatpush3.bf16.msra.mxu0 %v3218_v10  ;;  %v3235_v27 = vld [vmem:[%s4296_s1 + $0x88] sm:$0xff]   ;;  %v3239_v31 = vld [vmem:[%s4296_s1 + $0x80] sm:$0xff]   ;;  %v3241_v51 = vld [vmem:[%s4296_s1 + $0x1f8] sm:$0xff]  }
  0x20   : > { %2924 = vmatpush3.bf16.msra.mxu1 %v3219_v11  ;;  %2903 = vmatprep.subr.bf16.mxu0 %v3220_v12  ;;  %v3676_v32 = vld [vmem:[%s3667_s13 + $0x8] sm:$0xff]  ;;  %v3689_v39 = vld [vmem:[%s3667_s13] sm:$0xff]  ;;  %v3242_v0 = vld [vmem:[%s4296_s1 + $0x138] sm:$0xff]   ;;  %v450_v12 = vrot.slane %v3679_v33, 5 }
  0x21   : > { %2925 = vmatprep.subr.bf16.mxu1 %v3221_v13  ;;  %v3682_v34 = vld [vmem:[%s3667_s13 + $0x28] sm:$0xff]  ;;  %v401_v35 = vrot.slane %v3676_v32, 1  ;;  %v431_v42 = vrot.slane %v3676_v32, 2  ;;  %v3698_v44 = vld [vmem:[%s3667_s13 + $0x20] sm:$0xff]  ;;  %v398_v45 = vrot.slane %v3689_v39, 1  ;;  %v429_v63 = vrot.slane %v3689_v39, 2 }
  0x22   : > { %v417_v41 = vrot.slane %v3682_v34, 3  ;;  %v438_v43 = vrot.slane %v3682_v34, 4  ;;  %v414_v59 = vrot.slane %v3698_v44, 3  ;;  %v437_v2 = vrot.slane %v3698_v44, 4  ;;  %v3243_v3 = vld [vmem:[%s4296_s1 + $0x1b8] sm:$0xff]   ;;  %v3244_v6 = vld [vmem:[%s4296_s1 + $0x170] sm:$0xff]  }
  0x23   : > { %2904 = vmatpush3.bf16.msra.mxu0 %v3222_v14  ;;  %v403_v47 = vsel %vm397_vm0, %v401_v35, %v402_v36  ;;  %v432_v54 = vsel %vm428_vm3, %v431_v42, %v407_v37  ;;  %v400_v58 = vsel %vm397_vm0, %v398_v45, %v399_v48  ;;  %v430_v5 = vsel %vm428_vm3, %v429_v63, %v406_v49  ;;  %v3245_v11 = vld [vmem:[%s4296_s1 + $0x1f0] sm:$0xff]   ;;  %v3257_v36 = vld [vmem:[%s4296_s1 + $0x1d8] sm:$0xff]   ;;  %v3271_v63 = vld [vmem:[%s4296_s1 + $0x180] sm:$0xff]  }
  0x24   : > { %2926 = vmatpush3.bf16.msra.mxu1 %v3223_v15  ;;  %2905 = vmatprep.subr.bf16.mxu0 %v3224_v16  ;;  %v418_v52 = vsel %vm412_vm1, %v416_v38, %v417_v41  ;;  %v423_v53 = vsel %vm421_vm2, %v3676_v32, %v403_v47  ;;  %v444_v55 = vsel %vm421_vm2, %v416_v38, %v438_v43  ;;  %v449_v7 = vrot.slane %v3676_v32, 5  ;;  %v3246_v14 = vld [vmem:[%s4296_s1 + $0x130] sm:$0xff]   ;;  %v3259_v38 = vld [vmem:[%s4296_s1 + $0x198] sm:$0xff]  }
  0x25   : > { %2927 = vmatprep.subr.bf16.mxu1 %v3225_v17  ;;  %v425_v56 = vsel %vm421_vm2, %v407_v37, %v418_v52  ;;  %v442_v57 = vsel %vm421_vm2, %v401_v35, %v432_v54  ;;  %v422_v62 = vsel %vm421_vm2, %v3689_v39, %v400_v58  ;;  %v415_v1 = vsel %vm412_vm1, %v413_v50, %v414_v59  ;;  %v3247_v16 = vld [vmem:[%s4296_s1 + $0x1b0] sm:$0xff]   ;;  %v3256_v35 = vld [vmem:[%s4296_s1 + $0x158] sm:$0xff]   ;;  %v3270_v59 = vld [vmem:[%s4296_s1 + $0x100] sm:$0xff]  }
  0x26   : > { %v495_v60 = vpack.c.bf16 %v425_v56, %v423_v53  ;;  %v497_v61 = vpack.c.bf16 %v444_v55, %v442_v57  ;;  %v424_v4 = vsel %vm421_vm2, %v406_v49, %v415_v1  ;;  %v441_v9 = vsel %vm421_vm2, %v398_v45, %v430_v5  ;;  %v3258_v37 = vld [vmem:[%s4296_s1 + $0x118] sm:$0xff]   ;;  %v3260_v41 = vld [vmem:[%s4296_s1 + $0x150] sm:$0xff]   ;;  %v3264_v49 = vld [vmem:[%s4296_s1 + $0x148] sm:$0xff]  }
  0x27   : > { %2906 = vmatpush3.bf16.msra.mxu0 %v3226_v18  ;;  %v494_v8 = vpack.c.bf16 %v424_v4, %v422_v62  ;;  %v443_v10 = vsel %vm421_vm2, %v413_v50, %v437_v2  ;;  %v455_v15 = vrot.slane %v3679_v33, 6  ;;  %v451_v17 = vsel %vm445_vm4, %v449_v7, %v450_v12  ;;  %v3261_v43 = vld [vmem:[%s4296_s1 + $0x1d0] sm:$0xff]   ;;  %v3266_v53 = vld [vmem:[%s4296_s1 + $0x108] sm:$0xff]   ;;  %v3269_v56 = vld [vmem:[%s4296_s1 + $0x1c0] sm:$0xff]  }
  0x28   : > { %2928 = vmatpush3.bf16.msra.mxu1 %v3227_v19  ;;  %2907 = vmatprep.subr.bf16.mxu0 %v3228_v20  ;;  %v496_v13 = vpack.c.bf16 %v443_v10, %v441_v9  ;;  %v462_v18 = vrot.slane %v3679_v33, 7  ;;  %v3248_v19 = vld [vmem:[%s4296_s1 + $0x168] sm:$0xff]   ;;  %v463_v20 = vrot.slane %v3682_v34, 7  ;;  %v474_v42 = vrot.slane %v3676_v32, 6  ;;  %v3263_v48 = vld [vmem:[%s4296_s1 + $0x190] sm:$0xff]   ;;  %v3272_v33 = vld [vmem:[%s4298_s3 + $0x78] sm:$0xff]  }
  0x29   : > { %2929 = vmatprep.subr.bf16.mxu1 %v3229_v21  ;;  %1053 = vmatprep.mubr.bf16.mxu0 %v495_v60  ;;  %v3249_v21 = vld [vmem:[%s4296_s1 + $0x1e8] sm:$0xff]   ;;  %v446_v45 = vrot.slane %v3689_v39, 5  ;;  %v447_v47 = vrot.slane %v3692_v40, 5  ;;  %v454_v32 = vrot.slane %v3692_v40, 6  ;;  %v459_v50 = vrot.slane %v3692_v40, 7  ;;  %v3268_v40 = vld [vmem:[%s4296_s1 + $0x140] sm:$0xff]  }
  0x2a   : > { %1094 = vmatprep.mubr.bf16.mxu1 %v497_v61  ;;  %v460_v52 = vrot.slane %v3698_v44, 7  ;;  %v472_v54 = vrot.slane %v3689_v39, 6  ;;  %v3267_v55 = vld [vmem:[%s4296_s1 + $0x188] sm:$0xff]   ;;  %v485_v39 = vrot.slane %v3682_v34, 1  ;;  %v475_v60 = vsel %vm471_vm6, %v474_v42, %v455_v15  ;;  %v391_v1 = vld [vmem:[%s3667_s13 + $0x30] sm:$0x1] }
  0x2b   : > { %2908 = vmatpush3.bf16.msra.mxu0 %v3230_v22  ;;  %v468_v22 = vsel %vm421_vm2, %v451_v17, %v455_v15  ;;  %v448_v57 = vsel %vm445_vm4, %v446_v45, %v447_v47  ;;  %v482_v62 = vrot.slane %v3698_v44, 1  ;;  %v483_v5 = vrot.slane %v391_v1, 1  ;;  %v3273_v15 = vld [vmem:[%s4298_s3 + $0x38] sm:$0xff]   ;;  %v3278_v17 = vld [vmem:[%s4298_s3 + $0xf0] sm:$0xff]  }
  0x2c   : > { %2930 = vmatpush3.bf16.msra.mxu1 %v3231_v23  ;;  %2909 = vmatprep.subr.bf16.mxu0 %v3232_v24  ;;  %v3250_v23 = vld [vmem:[%s4296_s1 + $0x128] sm:$0xff]   ;;  %v464_v24 = vsel %vm458_vm5, %v462_v18, %v463_v20  ;;  %v461_v58 = vsel %vm458_vm5, %v459_v50, %v460_v52  ;;  %v473_v61 = vsel %vm471_vm6, %v472_v54, %v454_v32 }
  0x2d   : > { %2931 = vmatprep.subr.bf16.mxu1 %v3233_v25  ;;  %v3251_v25 = vld [vmem:[%s4296_s1 + $0x1a8] sm:$0xff]   ;;  %v469_v4 = vsel %vm421_vm2, %v461_v58, %v3698_v44  ;;  %v490_v7 = vsel %vm421_vm2, %v473_v61, %v459_v50  ;;  %v484_v9 = vsel %vm397_vm0, %v482_v62, %v483_v5 }
  0x2e   : > { %v492_v12 = vsel %vm421_vm2, %v3698_v44, %v484_v9  ;;  %v3275_v44 = vld [vmem:[%s4298_s3 + $0xb8] sm:$0xff]   ;;  %v3280_v20 = vld [vmem:[%s4298_s3 + $0x68] sm:$0xff]  }
  0x2f   : > { %2910 = vmatpush3.bf16.msra.mxu0 %v3234_v26  ;;  %v470_v26 = vsel %vm421_vm2, %v464_v24, %v3682_v34  ;;  %v3284_v24 = vld [vmem:[%s4298_s3 + $0x60] sm:$0xff]   ;;  %v3296_v5 = vld [vmem:[%s4298_s3 + $0x48] sm:$0xff]  }
  0x30   : > { %2932 = vmatpush3.bf16.msra.mxu1 %v3235_v27  ;;  %2911 = vmatprep.subr.bf16.mxu0 %v3236_v28  ;;  %v3252_v27 = vld [vmem:[%s4296_s1 + $0x160] sm:$0xff]   ;;  %v499_v28 = vpack.c.bf16 %v470_v26, %v468_v22  ;;  %v3281_v22 = vld [vmem:[%s4298_s3 + $0x28] sm:$0xff]  }
  0x31   : > { %2933 = vmatprep.subr.bf16.mxu1 %v3237_v29  ;;  %v3253_v29 = vld [vmem:[%s4296_s1 + $0x1e0] sm:$0xff]   ;;  %v3297_v9 = vld [vmem:[%s4298_s3 + $0x8] sm:$0xff]  }
  0x32   : > { %v3285_v26 = vld [vmem:[%s4298_s3 + $0x20] sm:$0xff]  }
  0x33   : > { %2912 = vmatpush3.bf16.msra.mxu0 %v3238_v30  ;;  %v3254_v30 = vld [vmem:[%s4296_s1 + $0x120] sm:$0xff]  }
  0x34   : > { %2934 = vmatpush3.bf16.msra.mxu1 %v3239_v31  ;;  %2941 = vmatprep.subr.bf16.mxu0 %v3240_v46  ;;  %v3255_v31 = vld [vmem:[%s4296_s1 + $0x1a0] sm:$0xff]   ;;  %v3262_v46 = vld [vmem:[%s4296_s1 + $0x110] sm:$0xff]  }
  0x35   : > { %2963 = vmatprep.subr.bf16.mxu1 %v3241_v51  ;;  %v3265_v51 = vld [vmem:[%s4296_s1 + $0x1c8] sm:$0xff]  }
  0x36   : > { %1054 = vmatmul.mubr.bf16.vlgmr.msra.gmra.mxu0 %v494_v8 }
  0x37   : > { %1095 = vmatmul.mubr.bf16.vlgmr.msra.gmra.mxu1 %v496_v13  ;;  %2942 = vmatpush3.bf16.msra.mxu0 %v3242_v0  ;;  %v392_v0 = vld [vmem:[%s3667_s13 + $0x38] sm:$0x1] }
  0x38   : > { %2964 = vmatpush3.bf16.msra.mxu1 %v3243_v3  ;;  %2943 = vmatprep.subr.bf16.mxu0 %v3244_v6  ;;  %v486_v2 = vrot.slane %v392_v0, 1  ;;  %v467_v3 = vsel %vm421_vm2, %v448_v57, %v454_v32  ;;  %v491_v6 = vsel %vm421_vm2, %v475_v60, %v462_v18  ;;  %v3277_v18 = vld [vmem:[%s4298_s3 + $0x30] sm:$0xff]  }
  0x39   : > { %2965 = vmatprep.subr.bf16.mxu1 %v3245_v11  ;;  %1135 = vmatprep.mubr.bf16.mxu0 %v499_v28  ;;  %v498_v11 = vpack.c.bf16 %v469_v4, %v467_v3  ;;  %v3288_v28 = vld [vmem:[%s4298_s3 + $0x58] sm:$0xff]   ;;  %v3295_v0 = vld [vmem:[%s4298_s3 + $0x90] sm:$0xff]  }
  0x3a   : > { %v487_v8 = vsel %vm397_vm0, %v485_v39, %v486_v2 }
  0x3b   : > { %2944 = vmatpush3.bf16.msra.mxu0 %v3246_v14  ;;  %v493_v10 = vsel %vm421_vm2, %v3682_v34, %v487_v8  ;;  %v500_v14 = vpack.c.bf16 %v492_v12, %v490_v7  ;;  %v3274_v34 = vld [vmem:[%s4298_s3 + $0xf8] sm:$0xff]  }
  0x3c   : > { %2966 = vmatpush3.bf16.msra.mxu1 %v3247_v16  ;;  %2945 = vmatprep.subr.bf16.mxu0 %v3248_v19  ;;  %v501_v13 = vpack.c.bf16 %v493_v10, %v491_v6  ;;  %v3276_v16 = vld [vmem:[%s4298_s3 + $0x70] sm:$0xff]   ;;  %v3298_v10 = vld [vmem:[%s4298_s3 + $0xc8] sm:$0xff]  }
  0x3d   : > { %2967 = vmatprep.subr.bf16.mxu1 %v3249_v21  ;;  %v3279_v19 = vld [vmem:[%s4298_s3 + $0xb0] sm:$0xff]   ;;  %v3282_v21 = vld [vmem:[%s4298_s3 + $0xe8] sm:$0xff]  }
  0x3e   : > { %1176 = vmatprep.mubr.bf16.mxu1 %v501_v13 }
  0x3f   : > { %2946 = vmatpush3.bf16.msra.mxu0 %v3250_v23  ;;  %v3283_v23 = vld [vmem:[%s4298_s3 + $0xa8] sm:$0xff]  }
  0x40   : > { %2968 = vmatpush3.bf16.msra.mxu1 %v3251_v25  ;;  %2947 = vmatprep.subr.bf16.mxu0 %v3252_v27  ;;  %v3286_v25 = vld [vmem:[%s4298_s3 + $0xe0] sm:$0xff]  }
  0x41   : > { %2969 = vmatprep.subr.bf16.mxu1 %v3253_v29  ;;  %v3287_v27 = vld [vmem:[%s4298_s3 + $0xa0] sm:$0xff]   ;;  %v3290_v29 = vld [vmem:[%s4298_s3 + $0xd8] sm:$0xff]  }
  0x43   : > { %2948 = vmatpush3.bf16.msra.mxu0 %v3254_v30  ;;  %v3289_v30 = vld [vmem:[%s4298_s3 + $0x18] sm:$0xff]  }
  0x44   : > { %2970 = vmatpush3.bf16.msra.mxu1 %v3255_v31  ;;  %2949 = vmatprep.subr.bf16.mxu0 %v3256_v35  ;;  %v3291_v31 = vld [vmem:[%s4298_s3 + $0x98] sm:$0xff]   ;;  %v3292_v35 = vld [vmem:[%s4298_s3 + $0x50] sm:$0xff]  }
  0x45   : > { %2971 = vmatprep.subr.bf16.mxu1 %v3257_v36  ;;  %v3294_v36 = vld [vmem:[%s4298_s3 + $0xd0] sm:$0xff]  }
  0x47   : > { %2950 = vmatpush3.bf16.msra.mxu0 %v3258_v37  ;;  %v3293_v37 = vld [vmem:[%s4298_s3 + $0x10] sm:$0xff]  }
  0x48   : > { %2972 = vmatpush3.bf16.msra.mxu1 %v3259_v38  ;;  %2951 = vmatprep.subr.bf16.mxu0 %v3260_v41 }
  0x49   : > { %2973 = vmatprep.subr.bf16.mxu1 %v3261_v43 }
  0x4b   : > { %2952 = vmatpush3.bf16.msra.mxu0 %v3262_v46 }
  0x4c   : > { %2974 = vmatpush3.bf16.msra.mxu1 %v3263_v48  ;;  %2953 = vmatprep.subr.bf16.mxu0 %v3264_v49  ;;  %v2708_v48 = vld [vmem:[%s4297_s2] ss:$0 sm:$0xff] }
  0x4d   : > { %2975 = vmatprep.subr.bf16.mxu1 %v3265_v51 }
  0x4f   : > { %2954 = vmatpush3.bf16.msra.mxu0 %v3266_v53 }
  0x50   : > { %2976 = vmatpush3.bf16.msra.mxu1 %v3267_v55  ;;  %2955 = vmatprep.subr.bf16.mxu0 %v3268_v40 }
  0x51   : > { %2977 = vmatprep.subr.bf16.mxu1 %v3269_v56 }
  0x53   : > { %2956 = vmatpush3.bf16.msra.mxu0 %v3270_v59 }
  0x54   : > { %2978 = vmatpush3.bf16.msra.mxu1 %v3271_v63  ;;  %2985 = vmatprep.subr.bf16.mxu0 %v3272_v33 }
  0x55   : > { %3007 = vmatprep.subr.bf16.mxu1 %v3274_v34  ;;  %v3302_v34 = vld [vmem:[%s4298_s3 + $0xc0] sm:$0xff]  }
  0x56   : > { %1136 = vmatmul.mubr.bf16.vlgmr.msra.gmra.mxu0 %v498_v11  ;;  %v3299_v11 = vld [vmem:[%s4298_s3 + $0x88] sm:$0xff]  }
  0x57   : > { %1177 = vmatmul.mubr.bf16.vlgmr.msra.gmra.mxu1 %v500_v14  ;;  %2986 = vmatpush3.bf16.msra.mxu0 %v3273_v15  ;;  %v3300_v14 = vld [vmem:[%s4298_s3 + $0x40] sm:$0xff]  }
  0x58   : > { %3008 = vmatpush3.bf16.msra.mxu1 %v3275_v44  ;;  %2987 = vmatprep.subr.bf16.mxu0 %v3276_v16  ;;  %v3301_v15 = vld [vmem:[%s4298_s3] sm:$0xff]  }
  0x59   : > { %3009 = vmatprep.subr.bf16.mxu1 %v3278_v17 }
  0x5b   : > { %2988 = vmatpush3.bf16.msra.mxu0 %v3277_v18  ;;  %v3303_v18 = vld [vmem:[%s4298_s3 + $0x80] sm:$0xff]  }
  0x5c   : > { %3010 = vmatpush3.bf16.msra.mxu1 %v3279_v19  ;;  %2989 = vmatprep.subr.bf16.mxu0 %v3280_v20 }
  0x5d   : > { %3011 = vmatprep.subr.bf16.mxu1 %v3282_v21 }
  0x5f   : > { %2990 = vmatpush3.bf16.msra.mxu0 %v3281_v22 }
  0x60   : > { %3012 = vmatpush3.bf16.msra.mxu1 %v3283_v23  ;;  %2991 = vmatprep.subr.bf16.mxu0 %v3284_v24 }
  0x61   : > { %3013 = vmatprep.subr.bf16.mxu1 %v3286_v25 }
  0x63   : > { %2992 = vmatpush3.bf16.msra.mxu0 %v3285_v26 }
  0x64   : > { %3014 = vmatpush3.bf16.msra.mxu1 %v3287_v27  ;;  %2993 = vmatprep.subr.bf16.mxu0 %v3288_v28 }
  0x65   : > { %3015 = vmatprep.subr.bf16.mxu1 %v3290_v29 }
  0x67   : > { %2994 = vmatpush3.bf16.msra.mxu0 %v3289_v30 }
  0x68   : > { %3016 = vmatpush3.bf16.msra.mxu1 %v3291_v31  ;;  %2995 = vmatprep.subr.bf16.mxu0 %v3292_v35 }
  0x69   : > { %3017 = vmatprep.subr.bf16.mxu1 %v3294_v36 }
  0x6b   : > { %2996 = vmatpush3.bf16.msra.mxu0 %v3293_v37 }
  0x6c   : > { %3018 = vmatpush3.bf16.msra.mxu1 %v3295_v0  ;;  %2997 = vmatprep.subr.bf16.mxu0 %v3296_v5 }
  0x6d   : > { %3019 = vmatprep.subr.bf16.mxu1 %v3298_v10  ;;  %v3307_v10 = vld [vmem:[%s4300_s5 + $0xb8] sm:$0xff]  }
  0x6f   : > { %2998 = vmatpush3.bf16.msra.mxu0 %v3297_v9  ;;  %v3306_v9 = vld [vmem:[%s4300_s5 + $0xf8] sm:$0xff]  }
  0x70   : > { %3020 = vmatpush3.bf16.msra.mxu1 %v3299_v11  ;;  %2999 = vmatprep.subr.bf16.mxu0 %v3300_v14  ;;  %v3308_v11 = vld [vmem:[%s4300_s5 + $0x70] sm:$0xff]  }
  0x71   : > { %3021 = vmatprep.subr.bf16.mxu1 %v3302_v34  ;;  %v3311_v14 = vld [vmem:[%s4300_s5 + $0xb0] sm:$0xff]   ;;  %v3313_v34 = vld [vmem:[%s4300_s5 + $0x28] sm:$0xff]  }
  0x73   : > { %3000 = vmatpush3.bf16.msra.mxu0 %v3301_v15  ;;  %v3314_v15 = vld [vmem:[%s4300_s5 + $0xe8] sm:$0xff]  }
  0x74   : > { %3022 = vmatpush3.bf16.msra.mxu1 %v3303_v18  ;;  %v3317_v18 = vld [vmem:[%s4300_s5 + $0x20] sm:$0xff]  }
  0x75   : > { %3051 = vmatprep.subr.bf16.mxu1 %v3306_v9 }
  0xf6   : > { %v2913_v38 = vpop.f32.mrf.mxu0 }
  0xf7   : > { %v2935_v41 = vpop.f32.mrf.mxu1 }
  0xf8   : > { %v2914_v42 = vpop.f32.mrf.mxu0 }
  0xf9   : > { %v2936_v43 = vpop.f32.mrf.mxu1  ;;  %v2915_v46 = vadd.f32 %v2914_v42, %v2913_v38 }
  0xfa   : > { %v2916_v45 = vpop.f32.mrf.mxu0  ;;  %v2937_v50 = vadd.f32 %v2936_v43, %v2935_v41 }
  0xfb   : > { %v2938_v47 = vpop.f32.mrf.mxu1  ;;  %v1056_v49 = vadd.f32 %v2915_v46, %v2708_v48 }
  0xfc   : > { %v2917_v32 = vpop.f32.mrf.mxu0 }
  0xfd   : > { %v2918_v51 = vadd.f32 %v2917_v32, %v2916_v45  ;;  %v2939_v52 = vpop.f32.mrf.mxu1  ;;  %v1097_v40 = vadd.f32 %v2937_v50, %v1056_v49 }
  0xfe   : > { %v2940_v59 = vadd.f32 %v2939_v52, %v2938_v47 }
  0xff   : > { %v1059_v56 = vadd.f32 %v2918_v51, %v2708_v48 }
 0x101   : > { %v1100_v1 = vadd.f32 %v2940_v59, %v1059_v56 }
 0x116   : > { %v2957_v53 = vpop.f32.mrf.mxu0 }
 0x117   : > { %v2979_v54 = vpop.f32.mrf.mxu1 }
 0x118   : > { %v2958_v55 = vpop.f32.mrf.mxu0 }
 0x119   : > { %v2959_v39 = vadd.f32 %v2958_v55, %v2957_v53  ;;  %v2980_v57 = vpop.f32.mrf.mxu1 }
 0x11a   : > { %v2960_v58 = vpop.f32.mrf.mxu0  ;;  %v2981_v61 = vadd.f32 %v2980_v57, %v2979_v54 }
 0x11b   : > { %v1138_v60 = vadd.f32 %v2959_v39, %v1097_v40  ;;  %v2982_v62 = vpop.f32.mrf.mxu1 }
 0x11c   : > { %v2961_v63 = vpop.f32.mrf.mxu0 }
 0x11d   : > { %v1179_v2 = vadd.f32 %v2981_v61, %v1138_v60  ;;  %v2962_v3 = vadd.f32 %v2961_v63, %v2960_v58  ;;  %v2983_v4 = vpop.f32.mrf.mxu1 }
 0x11e   : > { %v2984_v8 = vadd.f32 %v2983_v4, %v2982_v62 }
 0x11f   : > { %v1185_v6 = vmax.f32 %v1179_v2, 0.0  ;;  %v1141_v7 = vadd.f32 %v2962_v3, %v1100_v1 }
 0x121   : > { %v1182_v12 = vadd.f32 %v2984_v8, %v1141_v7  ;;  %v1188_v13 = vrot.slane %v1185_v6, 1  ;;  %v1201_v44 = vrot.slane %v1185_v6, 4  ;;  %v1195_v16 = vrot.slane %v1185_v6, 2  ;;  %v3304_v7 = vld [vmem:[%s4300_s5 + $0x78] sm:$0xff]  }
 0x122   : > { %v1209_v17 = vrot.slane %v1185_v6, 5  ;;  %v3305_v8 = vld [vmem:[%s4300_s5 + $0x38] sm:$0xff]   ;;  %3029 = vmatprep.subr.bf16.mxu0 %v3304_v7 }
 0x123   : > { %v1186_v33 = vmax.f32 %v1182_v12, 0.0  ;;  %v1193_v23 = vsel %vm445_vm4, %v1185_v6, %v1188_v13  ;;  %v1199_v30 = vsel %vm445_vm4, %v1188_v13, %v1195_v16  ;;  %v3310_v12 = vld [vmem:[%s4300_s5 + $0xf0] sm:$0xff]   ;;  %v3316_v16 = vld [vmem:[%s4300_s5 + $0x60] sm:$0xff]  }
 0x124   : > { %v3309_v13 = vld [vmem:[%s4300_s5 + $0x30] sm:$0xff]  }
 0x125   : > { %v1191_v19 = vrot.slane %v1186_v33, 2  ;;  %v1203_v20 = vrot.slane %v1186_v33, 5  ;;  %v1205_v21 = vrot.slane %v1186_v33, 6  ;;  %v1197_v22 = vrot.slane %v1186_v33, 3 }
 0x126   : > { %v1211_v24 = vrot.slane %v1186_v33, 7  ;;  %v3312_v33 = vld [vmem:[%s4300_s5 + $0x68] sm:$0xff]  }
 0x127   : > { %v1194_v25 = vsel %vm428_vm3, %v1193_v23, %v1191_v19  ;;  %v1207_v26 = vsel %vm445_vm4, %v1201_v44, %v1203_v20  ;;  %v1213_v27 = vsel %vm445_vm4, %v1209_v17, %v1205_v21  ;;  %v1200_v35 = vsel %vm428_vm3, %v1199_v30, %v1197_v22  ;;  %v3315_v44 = vld [vmem:[%s4300_s5 + $0xa8] sm:$0xff]   ;;  %v3318_v17 = vld [vmem:[%s4300_s5 + $0xe0] sm:$0xff]   ;;  %v3320_v20 = vld [vmem:[%s4300_s5 + $0x58] sm:$0xff]  }
 0x128   : > { %v3178_v28 = vpack.i.bf16 %v1191_v19, %v1194_v25  ;;  %v1208_v29 = vsel %vm428_vm3, %v1207_v26, %v1205_v21  ;;  %v1214_v36 = vsel %vm428_vm3, %v1213_v27, %v1211_v24  ;;  %v3183_v37 = vpack.i.bf16 %v1197_v22, %v1200_v35  ;;  %v3323_v23 = vld [vmem:[%s4300_s5 + $0x98] sm:$0xff]   ;;  %v3325_v26 = vld [vmem:[%s4300_s5 + $0x10] sm:$0xff]   ;;  %v3329_v30 = vld [vmem:[%s4300_s5 + $0x8] sm:$0xff]  }
 0x129   : > { %v3188_v31 = vpack.i.bf16 %v1205_v21, %v1208_v29  ;;  %v3193_v38 = vpack.i.bf16 %v1211_v24, %v1214_v36  ;;  %v3327_v27 = vld [vmem:[%s4300_s5 + $0x90] sm:$0xff]  }
 0x12a   : > { %3179 = vrot.lane.b32.xlu0 %v3178_v28, %s3458_s25  ;;  %v3328_v28 = vld [vmem:[%s4300_s5 + $0x48] sm:$0xff]  }
 0x12b   : > { %3189 = vrot.lane.b32.xlu1 %v3188_v31, %s3458_s25  ;;  %v3331_v31 = vld [vmem:[%s4300_s5 + $0x88] sm:$0xff]  }
 0x12e   : > { %3184 = vrot.lane.b32.xlu0 %v3183_v37, %s3458_s25  ;;  %v2773_v37 = vld [vmem:[%s4299_s4] ss:$0 sm:$0xff] }
 0x12f   : > { %3194 = vrot.lane.b32.xlu1 %v3193_v38, %s3458_s25 }
 0x19c   : > { %v3180_v41 = vpop.permute.xlu0 %3179 }
 0x19d   : > { %v3182_v42 = vunpack.i.h.bf16 %v3180_v41  ;;  %v3181_v43 = vunpack.i.l.bf16 %v3180_v41  ;;  %v3190_v45 = vpop.permute.xlu1 %3189  ;;  %v3332_v41 = vld [vmem:[%s4300_s5 + $0x40] sm:$0xff]  }
 0x19e   : > { %v3192_v46 = vunpack.i.h.bf16 %v3190_v45  ;;  %v3191_v47 = vunpack.i.l.bf16 %v3190_v45  ;;  %v3333_v45 = vld [vmem:[%s4300_s5] sm:$0xff]  }
 0x19f   : > { %v1250_v48 = vsel %vm1243_vm7, %v3182_v42, %v1197_v22  ;;  %v1249_v32 = vsel %vm1243_vm7, %v3181_v43, %v1200_v35 }
 0x1a0   : > { %v1258_v49 = vsel %vm1243_vm7, %v3192_v46, %v1211_v24  ;;  %v1257_v50 = vsel %vm1243_vm7, %v3191_v47, %v1214_v36  ;;  %v3185_v51 = vpop.permute.xlu0 %3184  ;;  %v1251_v52 = vsel %vm1246_vm8, %v1249_v32, %v1200_v35  ;;  %v1252_v53 = vsel %vm1246_vm8, %v1250_v48, %v1197_v22  ;;  %v3321_v22 = vld [vmem:[%s4300_s5 + $0x18] sm:$0xff]   ;;  %v3334_v46 = vld [vmem:[%s4300_s5 + $0xc0] sm:$0xff]  }
 0x1a1   : > { %v3187_v54 = vunpack.i.h.bf16 %v3185_v51  ;;  %v3186_v55 = vunpack.i.l.bf16 %v3185_v51  ;;  %v3195_v40 = vpop.permute.xlu1 %3194  ;;  %v1262_v56 = vpack.c.bf16 %v1252_v53, %v1251_v52  ;;  %v1259_v39 = vsel %vm1246_vm8, %v1257_v50, %v1214_v36  ;;  %v3335_v48 = vld [vmem:[%s4300_s5 + $0x80] sm:$0xff]  }
 0x1a2   : > { %v3197_v57 = vunpack.i.h.bf16 %v3195_v40  ;;  %v3196_v58 = vunpack.i.l.bf16 %v3195_v40  ;;  %v1260_v59 = vsel %vm1246_vm8, %v1258_v49, %v1211_v24  ;;  %v3324_v24 = vld [vmem:[%s4300_s5 + $0x50] sm:$0xff]   ;;  %v3459_v50 = vmov 0.0  }
 0x1a3   : > { %v1245_v60 = vsel %vm1243_vm7, %v1191_v19, %v3187_v54  ;;  %v1244_v61 = vsel %vm1243_vm7, %v1194_v25, %v3186_v55  ;;  %1560 = vmatprep.mubr.bf16.mxu0 %v1262_v56  ;;  %v1264_v62 = vpack.c.bf16 %v1260_v59, %v1259_v39  ;;  %v3319_v19 = vld [vmem:[%s4300_s5 + $0xa0] sm:$0xff]   ;;  %v3326_v25 = vld [vmem:[%s4300_s5 + $0xd0] sm:$0xff]  }
 0x1a4   : > { %v1248_v63 = vsel %vm1246_vm8, %v1245_v60, %v3187_v54  ;;  %v1247_v0 = vsel %vm1246_vm8, %v1244_v61, %v3186_v55  ;;  %v1254_v1 = vsel %vm1243_vm7, %v1205_v21, %v3197_v57  ;;  %v1253_v2 = vsel %vm1243_vm7, %v1208_v29, %v3196_v58  ;;  %v3322_v21 = vld [vmem:[%s4300_s5 + $0xd8] sm:$0xff]   ;;  %v3330_v29 = vld [vmem:[%s4300_s5 + $0xc8] sm:$0xff]  }
 0x1a5   : > { %v1261_v3 = vpack.c.bf16 %v1248_v63, %v1247_v0  ;;  %v1256_v4 = vsel %vm1246_vm8, %v1254_v1, %v3197_v57  ;;  %v1255_v5 = vsel %vm1246_vm8, %v1253_v2, %v3196_v58  ;;  %1601 = vmatprep.mubr.bf16.mxu1 %v1264_v62 }
 0x1a6   : > { %v1263_v6 = vpack.c.bf16 %v1256_v4, %v1255_v5 }
 0x1a7   : > { %1561 = vmatmul.mubr.bf16.vlgmr.msra.gmra.mxu0 %v1261_v3 }
 0x1a8   : > { %1602 = vmatmul.mubr.bf16.vlgmr.msra.gmra.mxu1 %v1263_v6  ;;  %3030 = vmatpush3.bf16.msra.mxu0 %v3305_v8 }
 0x1a9   : > { %3052 = vmatpush3.bf16.msra.mxu1 %v3307_v10  ;;  %3031 = vmatprep.subr.bf16.mxu0 %v3308_v11 }
 0x1aa   : > { %3053 = vmatprep.subr.bf16.mxu1 %v3310_v12  ;;  %v3336_v12 = vld [vmem:[%s4300_s5 + $0x118] sm:$0xff]  }
 0x1ac   : > { %3032 = vmatpush3.bf16.msra.mxu0 %v3309_v13 }
 0x1ad   : > { %3054 = vmatpush3.bf16.msra.mxu1 %v3311_v14  ;;  %3033 = vmatprep.subr.bf16.mxu0 %v3312_v33  ;;  %v3337_v33 = vld [vmem:[%s4300_s5 + $0x110] sm:$0xff]  }
 0x1ae   : > { %3055 = vmatprep.subr.bf16.mxu1 %v3314_v15 }
 0x1b0   : > { %3034 = vmatpush3.bf16.msra.mxu0 %v3313_v34 }
 0x1b1   : > { %3056 = vmatpush3.bf16.msra.mxu1 %v3315_v44  ;;  %3035 = vmatprep.subr.bf16.mxu0 %v3316_v16  ;;  %v3338_v44 = vld [vmem:[%s4300_s5 + $0x108] sm:$0xff]  }
 0x1b2   : > { %3057 = vmatprep.subr.bf16.mxu1 %v3318_v17  ;;  %v3339_v17 = vld [vmem:[%s4300_s5 + $0x100] sm:$0xff]  }
 0x1b4   : > { %3036 = vmatpush3.bf16.msra.mxu0 %v3317_v18 }
 0x1b5   : > { %3058 = vmatpush3.bf16.msra.mxu1 %v3319_v19  ;;  %3037 = vmatprep.subr.bf16.mxu0 %v3320_v20  ;;  %v3342_v20 = vld [vmem:[%s4302_s7 + $0x64] ss:$16 sps:$4 sm:$0xff]  }
 0x1b6   : > { %3059 = vmatprep.subr.bf16.mxu1 %v3322_v21  ;;  %v3345_v21 = vld [vmem:[%s4302_s7 + $0x6c] ss:$16 sps:$4 sm:$0xff]  }
 0x1b8   : > { %3038 = vmatpush3.bf16.msra.mxu0 %v3321_v22  ;;  %v3340_v22 = vld [vmem:[%s4302_s7 + $0x60] ss:$16 sps:$4 sm:$0xff]  }
 0x1b9   : > { %3060 = vmatpush3.bf16.msra.mxu1 %v3323_v23  ;;  %3039 = vmatprep.subr.bf16.mxu0 %v3324_v24  ;;  %v3343_v23 = vld [vmem:[%s4302_s7 + $0x68] ss:$16 sps:$4 sm:$0xff]   ;;  %v3348_v24 = vld [vmem:[%s4302_s7 + $0x44] ss:$16 sps:$4 sm:$0xff]  }
 0x1ba   : > { %3061 = vmatprep.subr.bf16.mxu1 %v3326_v25  ;;  %v3351_v25 = vld [vmem:[%s4302_s7 + $0x4c] ss:$16 sps:$4 sm:$0xff]  }
 0x1bc   : > { %3040 = vmatpush3.bf16.msra.mxu0 %v3325_v26  ;;  %v3346_v26 = vld [vmem:[%s4302_s7 + $0x40] ss:$16 sps:$4 sm:$0xff]  }
 0x1bd   : > { %3062 = vmatpush3.bf16.msra.mxu1 %v3327_v27  ;;  %3041 = vmatprep.subr.bf16.mxu0 %v3328_v28  ;;  %v3349_v27 = vld [vmem:[%s4302_s7 + $0x48] ss:$16 sps:$4 sm:$0xff]   ;;  %v3354_v28 = vld [vmem:[%s4302_s7 + $0x24] ss:$16 sps:$4 sm:$0xff]  }
 0x1be   : > { %3063 = vmatprep.subr.bf16.mxu1 %v3330_v29  ;;  %v3357_v29 = vld [vmem:[%s4302_s7 + $0x2c] ss:$16 sps:$4 sm:$0xff]  }
 0x1c0   : > { %3042 = vmatpush3.bf16.msra.mxu0 %v3329_v30  ;;  %v3352_v30 = vld [vmem:[%s4302_s7 + $0x20] ss:$16 sps:$4 sm:$0xff]  }
 0x1c1   : > { %3064 = vmatpush3.bf16.msra.mxu1 %v3331_v31  ;;  %3043 = vmatprep.subr.bf16.mxu0 %v3332_v41  ;;  %v3355_v31 = vld [vmem:[%s4302_s7 + $0x28] ss:$16 sps:$4 sm:$0xff]   ;;  %v3461_v41 = vmov 0  }
 0x1c2   : > { %3065 = vmatprep.subr.bf16.mxu1 %v3334_v46 }
 0x1c4   : > { %3044 = vmatpush3.bf16.msra.mxu0 %v3333_v45 }
 0x1c5   : > { %3066 = vmatpush3.bf16.msra.mxu1 %v3335_v48  ;;  %3122 = vmatprep.subr.bf16.mxu0 %v3459_v50 }
 0x1c6   : > { %2166 = vmatprep.subr.bf16.mxu1 %v3342_v20  ;;  %v3391_v20 = vld [vmem:[%s4304_s9 + $0x88] sm:$0xff]  }
 0x267   : > { %v3001_v35 = vpop.f32.mrf.mxu0 }
 0x268   : > { %v3023_v36 = vpop.f32.mrf.mxu1 }
 0x269   : > { %v3002_v38 = vpop.f32.mrf.mxu0 }
 0x26a   : > { %v3003_v42 = vadd.f32 %v3002_v38, %v3001_v35  ;;  %v3024_v43 = vpop.f32.mrf.mxu1  ;;  %v3360_v35 = vld [vmem:[%s4302_s7 + $0x4] ss:$16 sps:$4 sm:$0xff]   ;;  %v3361_v38 = vld [vmem:[%s4302_s7 + $0x8] ss:$16 sps:$4 sm:$0xff]  }
 0x26b   : > { %v3025_v47 = vadd.f32 %v3024_v43, %v3023_v36  ;;  %v3004_v39 = vpop.f32.mrf.mxu0  ;;  %v3363_v36 = vld [vmem:[%s4302_s7 + $0xc] ss:$16 sps:$4 sm:$0xff]  }
 0x26c   : > { %v1563_v32 = vadd.f32 %v3003_v42, %v2773_v37  ;;  %v3026_v2 = vpop.f32.mrf.mxu1  ;;  %v3364_v42 = vld [vmem:[%s4304_s9 + $0x78] sm:$0xff]  }
 0x26d   : > { %v3005_v3 = vpop.f32.mrf.mxu0  ;;  %v3365_v43 = vld [vmem:[%s4304_s9 + $0xf8] sm:$0xff]  }
 0x26e   : > { %v1604_v49 = vadd.f32 %v3025_v47, %v1563_v32  ;;  %v3006_v13 = vadd.f32 %v3005_v3, %v3004_v39  ;;  %v3027_v14 = vpop.f32.mrf.mxu1  ;;  %v3371_v3 = vld [vmem:[%s4304_s9 + $0xb0] sm:$0xff]  }
 0x26f   : > { %v3028_v34 = vadd.f32 %v3027_v14, %v3026_v2  ;;  %v3370_v2 = vld [vmem:[%s4304_s9 + $0x30] sm:$0xff]   ;;  %v3382_v14 = vld [vmem:[%s4304_s9 + $0x18] sm:$0xff]  }
 0x270   : > { %v1610_v51 = vmax.f32 %v1604_v49, 0.0  ;;  %v1566_v15 = vadd.f32 %v3006_v13, %v2773_v37  ;;  %v3358_v37 = vld [vmem:[%s4302_s7] ss:$16 sps:$4 sm:$0xff]   ;;  %v3381_v13 = vld [vmem:[%s4304_s9 + $0xd8] sm:$0xff]  }
 0x272   : > { %v1625_v52 = vrot.slane %v1610_v51, 5  ;;  %v1631_v53 = vrot.slane %v1610_v51, 7  ;;  %v1613_v54 = vrot.slane %v1610_v51, 1  ;;  %v1619_v55 = vrot.slane %v1610_v51, 3 }
 0x273   : > { %v1623_v60 = vrot.slane %v1610_v51, 4  ;;  %v1629_v62 = vrot.slane %v1610_v51, 6  ;;  %v1617_v1 = vrot.slane %v1610_v51, 2  ;;  %v1607_v16 = vadd.f32 %v3028_v34, %v1566_v15  ;;  %v3384_v15 = vld [vmem:[%s4304_s9 + $0x50] sm:$0xff]  }
 0x274   : > { %v3203_v40 = vpack.i.bf16 %v1625_v52, %v1631_v53  ;;  %v3198_v56 = vpack.i.bf16 %v1613_v54, %v1619_v55  ;;  %v1716_v53 = vld [vmem:[%s4301_s6] sm:$0x1]  ;;  %v3385_v34 = vld [vmem:[%s4304_s9 + $0xd0] sm:$0xff]  }
 0x275   : > { %v1611_v18 = vmax.f32 %v1607_v16, 0.0  ;;  %v3387_v16 = vld [vmem:[%s4304_s9 + $0x90] sm:$0xff]  }
 0x276   : > { %3204 = vrot.lane.b32.xlu1 %v3203_v40, %s3458_s25  ;;  %3199 = vrot.lane.b32.xlu0 %v3198_v56, %s3458_s25  ;;  %s377_s25 = sand.u32 1, %s3448_s18  }
 0x277   : > { %v1643_v19 = vpack.c.bf16 %v1611_v18, %v1611_v18  ;;  %v3389_v18 = vld [vmem:[%s4304_s9 + $0xc8] sm:$0xff]   ;;  %s378_s26 = scalar_lea.vmem [#allocation2], %s377_s25  ;;  %s2635_s19 = scalar_lea.sflag [#allocation3], %s377_s25 }
 0x278   : > { %s2647_s16 = sshll.u32 %s378_s26, 4  ;;  %s2648_s16 = int_to_ptr.vmem [resolvable:$true] %s2647_s16 }
 0x279   : > { %s3396_s15 = scalar_lea.vmem %s2648_s16, 16  ;;  %p3403_p0 = scmp.lt.s32.totalorder %s2648_s16, %s3401_s24 }
 0x27a   : > { %p3397_p11 = scmp.ne.s32.totalorder %s2648_s16, %s3396_s15  ;;  %p3404_p1 = scmp.lt.s32.totalorder %s3402_s29, %s3396_s15 }
 0x27c   : > { %p3398_p12 = pnand %p3397_p11, %p3562_p5  ;;  %p3405_p2 = por %p3404_p1, %p3403_p0 }
 0x27e   : > { %p3399_p13 = pneg %p3398_p12 }
 0x280   : > { %p3406_p3 = pnand %p3405_p2, %p3399_p13 }
 0x2e8   : > { %v3205_v57 = vpop.permute.xlu1 %3204  ;;  %v3200_v61 = vpop.permute.xlu0 %3199 }
 0x2e9   : > { %v3207_v58 = vunpack.i.h.bf16 %v3205_v57  ;;  %v3206_v59 = vunpack.i.l.bf16 %v3205_v57  ;;  %v3202_v63 = vunpack.i.h.bf16 %v3200_v61  ;;  %v3201_v0 = vunpack.i.l.bf16 %v3200_v61  ;;  %v3367_v61 = vld [vmem:[%s4304_s9 + $0xb8] sm:$0xff]  }
 0x2eb   : > { %v1637_v4 = vsel %vm1243_vm7, %v1623_v60, %v3207_v58  ;;  %v1638_v5 = vsel %vm1243_vm7, %v1629_v62, %v3206_v59  ;;  %v1635_v7 = vsel %vm1243_vm7, %v1610_v51, %v3202_v63  ;;  %v1636_v8 = vsel %vm1243_vm7, %v1617_v1, %v3201_v0  ;;  %v3366_v60 = vld [vmem:[%s4304_s9 + $0x38] sm:$0xff]   ;;  %v3368_v63 = vld [vmem:[%s4304_s9 + $0x70] sm:$0xff]  }
 0x2ec   : > { %v1641_v6 = vpack.c.bf16 %v1637_v4, %v1637_v4  ;;  %v1642_v9 = vpack.c.bf16 %v1638_v5, %v1638_v5  ;;  %v1639_v10 = vpack.c.bf16 %v1635_v7, %v1635_v7  ;;  %v1640_v11 = vpack.c.bf16 %v1636_v8, %v1636_v8  ;;  %v3369_v0 = vld [vmem:[%s4304_s9 + $0xf0] sm:$0xff]   ;;  %v3372_v4 = vld [vmem:[%s4304_s9 + $0x68] sm:$0xff]   ;;  %v3376_v8 = vld [vmem:[%s4304_s9 + $0x60] sm:$0xff]  }
 0x2ed   : > { %v3373_v5 = vld [vmem:[%s4304_s9 + $0xe8] sm:$0xff]  }
 0x2ee   : > { %2008 = vmatprep.mubr.bf16.mxu1 %v1642_v9  ;;  %1968 = vmatprep.mubr.bf16.mxu0 %v1640_v11  ;;  %v3375_v7 = vld [vmem:[%s4304_s9 + $0xa8] sm:$0xff]   ;;  %v3377_v9 = vld [vmem:[%s4304_s9 + $0xe0] sm:$0xff]  }
 0x2ef   : > { %2009 = vmatmul.mubr.bf16.vlgmr.msra.gmra.mxu1 %v1641_v6  ;;  %1969 = vmatmul.mubr.bf16.vlgmr.msra.gmra.mxu0 %v1639_v10  ;;  %v3374_v6 = vld [vmem:[%s4304_s9 + $0x28] sm:$0xff]   ;;  %v3378_v10 = vld [vmem:[%s4304_s9 + $0x20] sm:$0xff]  }
 0x2f0   : > { %3123 = vmatpush3.bf16.msra.mxu0 %v3336_v12  ;;  %3130 = vmatprep.mubr.msk.bf16.mxu0 %vm3460_vm9, %v3459_v50  ;;  %v3379_v11 = vld [vmem:[%s4304_s9 + $0xa0] sm:$0xff]   ;;  %v3380_v12 = vld [vmem:[%s4304_s9 + $0x58] sm:$0xff]  }
 0x2f1   : > { %3124 = vmatprep.subr.bf16.mxu0 %v3459_v50  ;;  %2167 = vmatpush1.bf16.msra.mxu1 %v3340_v22  ;;  %v3393_v22 = vld [vmem:[%s4304_s9 + $0xc0] sm:$0xff]  }
 0x2f2   : > { %2168 = vmatprep.subr.bf16.mxu1 %v3348_v24  ;;  %2190 = vmatprep.mubr.bf16.mxu1 %v3461_v41  ;;  %v3395_v24 = vld [vmem:[%s4304_s9 + $0x80] sm:$0xff]  }
 0x2f4   : > { %3125 = vmatpush3.bf16.msra.mxu0 %v3337_v33  ;;  %v3383_v33 = vld [vmem:[%s4304_s9 + $0x98] sm:$0xff]  }
 0x2f5   : > { %3126 = vmatprep.subr.bf16.mxu0 %v3459_v50  ;;  %2169 = vmatpush1.bf16.msra.mxu1 %v3346_v26 }
 0x2f6   : > { %2170 = vmatprep.subr.bf16.mxu1 %v3354_v28 }
 0x2f8   : > { %3127 = vmatpush3.bf16.msra.mxu0 %v3338_v44  ;;  %v3386_v44 = vld [vmem:[%s4304_s9 + $0x10] sm:$0xff]  }
 0x2f9   : > { %3128 = vmatprep.subr.bf16.mxu0 %v3459_v50  ;;  %2171 = vmatpush1.bf16.msra.mxu1 %v3352_v30 }
 0x2fa   : > { %2172 = vmatprep.subr.bf16.mxu1 %v3360_v35 }
 0x2fc   : > { %3129 = vmatpush3.bf16.msra.mxu0 %v3339_v17  ;;  %v3388_v17 = vld [vmem:[%s4304_s9 + $0x48] sm:$0xff]  }
 0x2fd   : > { %2207 = vmatprep.subr.bf16.mxu0 %v3345_v21  ;;  %2173 = vmatpush1.bf16.msra.mxu1 %v3358_v37  ;;  %v3392_v21 = vld [vmem:[%s4304_s9 + $0x40] sm:$0xff]  }
 0x2fe   : > { %3078 = vmatprep.subr.bf16.mxu1 %v3364_v42 }
 0x2ff   : > { %3131 = vmatmul.mubr.msk.bf16.vlgmr.msra.gmra.mxu0 %vm1243_vm7, %v1643_v19  ;;  %v3390_v19 = vld [vmem:[%s4304_s9 + $0x8] sm:$0xff]  }
 0x300   : > { %2208 = vmatpush1.bf16.msra.mxu0 %v3343_v23  ;;  %2231 = vmatprep.mubr.bf16.mxu0 %v3461_v41  ;;  %v3394_v23 = vld [vmem:[%s4304_s9] sm:$0xff]  }
 0x301   : > { %2209 = vmatprep.subr.bf16.mxu0 %v3351_v25  ;;  %v3462_v25 = vmov 1966171168  }
 0x302   : > { %v2247_v26 = vunpack.c.l.s4 %v3462_v25 }
 0x304   : > { %2210 = vmatpush1.bf16.msra.mxu0 %v3349_v27  ;;  %v2249_v27 = vlaneseq  ;;  %v2248_v28 = vunpack.c.0.s8 %v2247_v26 }
 0x305   : > { %2211 = vmatprep.subr.bf16.mxu0 %v3357_v29 }
 0x306   : > { %v2250_v29 = vshrl.u32 %v2249_v27, 7 }
 0x308   : > { %2212 = vmatpush1.bf16.msra.mxu0 %v3355_v31  ;;  %v2251_v35 = vsub.s32 %v2248_v28, %v2250_v29 }
 0x309   : > { %2213 = vmatprep.subr.bf16.mxu0 %v3363_v36 }
 0x30c   : > { %2214 = vmatpush1.bf16.msra.mxu0 %v3361_v38 }
 0x30d   : > { %3100 = vmatprep.subr.bf16.mxu0 %v3365_v43 }
 0x3af   : > { %v3067_v45 = vpop.f32.mrf.mxu1  ;;  %v3045_v46 = vpop.f32.mrf.mxu0 }
 0x3b1   : > { %v3068_v47 = vpop.f32.mrf.mxu1  ;;  %v3046_v48 = vpop.f32.mrf.mxu0 }
 0x3b2   : > { %v3047_v52 = vadd.f32 %v3046_v48, %v3045_v46  ;;  %v3069_v55 = vadd.f32 %v3068_v47, %v3067_v45 }
 0x3b3   : > { %v3070_v32 = vpop.f32.mrf.mxu1  ;;  %v3048_v49 = vpop.f32.mrf.mxu0 }
 0x3b4   : > { %v1971_v54 = vadd.f32 %v3047_v52, %v1716_v53  ;;  %v2057_v49 = vld [vmem:[%s4303_s8] sm:$0xf]  ;;  %v2286_v53 = vsub.s32 3, %v2250_v29 }
 0x3b5   : > { %v3071_v50 = vpop.f32.mrf.mxu1  ;;  %v3049_v51 = vpop.f32.mrf.mxu0 }
 0x3b6   : > { %v2011_v40 = vadd.f32 %v3069_v55, %v1971_v54  ;;  %v2278_v51 = vsub.s32 1, %v2250_v29  ;;  %v2274_v54 = vsub.s32 0, %v2250_v29  ;;  %v2282_v55 = vsub.s32 2, %v2250_v29 }
 0x3bf   : > { %v2050_v56 = vpop.f32.mrf.mxu0 }
 0x3c0   : > { %v2051_v39 = vadd.f32 %v2050_v56, %v2011_v40 }
 0x3c1   : > { %v3132_v57 = vpop.f32.mrf.mxu0 }
 0x3c2   : > { %v2056_v58 = vmax.f32 %v2051_v39, 0.0 }
 0x3c3   : > { %v2053_v59 = vpop.f32.mrf.mxu0 }
 0x3c4   : > { %v2058_v62 = vpack.c.bf16 %v2056_v58, %v2056_v58 }
 0x3c5   : > { %v3133_v1 = vpop.f32.mrf.mxu0 }
 0x3c6   : > { %2859 = vmatmul.mubr.msk.bf16.vlgmr.msra.gmra.mxu1 %vm1243_vm7, %v2058_v62  ;;  %2860 = vmatmul.mubr.msk.bf16.vlgmr.msra.gmra.mxu0 %vm1243_vm7, %v2058_v62  ;;  %v2360_v1 = vld [vmem:[%s4305_s10] sm:$0x1] }
 0x3c7   : > { %3079 = vmatpush3.bf16.msra.mxu1 %v3366_v60  ;;  %3101 = vmatpush3.bf16.msra.mxu0 %v3367_v61 }
 0x3c8   : > { %3080 = vmatprep.subr.bf16.mxu1 %v3368_v63  ;;  %3102 = vmatprep.subr.bf16.mxu0 %v3369_v0 }
 0x3cb   : > { %3081 = vmatpush3.bf16.msra.mxu1 %v3370_v2  ;;  %3103 = vmatpush3.bf16.msra.mxu0 %v3371_v3 }
 0x3cc   : > { %3082 = vmatprep.subr.bf16.mxu1 %v3372_v4  ;;  %3104 = vmatprep.subr.bf16.mxu0 %v3373_v5 }
 0x3cf   : > { %3083 = vmatpush3.bf16.msra.mxu1 %v3374_v6  ;;  %3105 = vmatpush3.bf16.msra.mxu0 %v3375_v7 }
 0x3d0   : > { %3084 = vmatprep.subr.bf16.mxu1 %v3376_v8  ;;  %3106 = vmatprep.subr.bf16.mxu0 %v3377_v9 }
 0x3d3   : > { %3085 = vmatpush3.bf16.msra.mxu1 %v3378_v10  ;;  %3107 = vmatpush3.bf16.msra.mxu0 %v3379_v11 }
 0x3d4   : > { %3086 = vmatprep.subr.bf16.mxu1 %v3380_v12  ;;  %3108 = vmatprep.subr.bf16.mxu0 %v3381_v13 }
 0x3d7   : > { %3087 = vmatpush3.bf16.msra.mxu1 %v3382_v14  ;;  %3109 = vmatpush3.bf16.msra.mxu0 %v3383_v33 }
 0x3d8   : > { %3088 = vmatprep.subr.bf16.mxu1 %v3384_v15  ;;  %3110 = vmatprep.subr.bf16.mxu0 %v3385_v34 }
 0x3db   : > { %3089 = vmatpush3.bf16.msra.mxu1 %v3386_v44  ;;  %3111 = vmatpush3.bf16.msra.mxu0 %v3387_v16 }
 0x3dc   : > { %3090 = vmatprep.subr.bf16.mxu1 %v3388_v17  ;;  %3112 = vmatprep.subr.bf16.mxu0 %v3389_v18 }
 0x3df   : > { %3091 = vmatpush3.bf16.msra.mxu1 %v3390_v19  ;;  %3113 = vmatpush3.bf16.msra.mxu0 %v3391_v20 }
 0x3e0   : > { %3092 = vmatprep.subr.bf16.mxu1 %v3392_v21  ;;  %3114 = vmatprep.subr.bf16.mxu0 %v3393_v22 }
 0x3e3   : > { %3093 = vmatpush3.bf16.msra.mxu1 %v3394_v23  ;;  %3115 = vmatpush3.bf16.msra.mxu0 %v3395_v24 }
 0x486   : > { %v2192_v30 = vpop.f32.mrf.mxu1  ;;  %v2233_v31 = vpop.f32.mrf.mxu0 }
 0x488   : > { %v2194_v36 = vpop.f32.mrf.mxu1  ;;  %v2235_v37 = vpop.f32.mrf.mxu0 }
 0x489   : > { %v2244_v38 = vcombine.low %v2192_v30, %v2194_v36  ;;  %v2245_v41 = vcombine.low %v2233_v31, %v2235_v37 }
 0x48a   : > { %v2196_v42 = vpop.f32.mrf.mxu1  ;;  %v2237_v43 = vpop.f32.mrf.mxu0 }
 0x48b   : > { %v2252_v45 = vrot.slane %v2244_v38, %v2251_v35  ;;  %v2259_v46 = vrot.slane %v2245_v41, %v2251_v35 }
 0x48c   : > { %v2197_v47 = vpop.f32.mrf.mxu1  ;;  %v2238_v48 = vpop.f32.mrf.mxu0 }
 0x48d   : > { %v2260_v32 = vcombine.low %v2252_v45, %v2259_v46 }
 0x48f   : > { %v2267_v50 = vrot.slane %v2260_v32, %v2251_v35 }
 0x491   : > { %v2269_v52 = vadd.f32 %v2267_v50, %v2057_v49 }
 0x493   : > { %v2270_v40 = vmax.f32 %v2269_v52, 0.0 }
 0x495   : > { %v2279_v56 = vrot.slane %v2270_v40, %v2278_v51  ;;  %v2287_v39 = vrot.slane %v2270_v40, %v2286_v53  ;;  %v2275_v57 = vrot.slane %v2270_v40, %v2274_v54  ;;  %v2283_v58 = vrot.slane %v2270_v40, %v2282_v55 }
 0x497   : > { %v2293_v59 = vpack.c.bf16 %v2279_v56, %v2279_v56  ;;  %v2295_v60 = vpack.c.bf16 %v2287_v39, %v2287_v39  ;;  %v2292_v61 = vpack.c.bf16 %v2275_v57, %v2275_v57  ;;  %v2294_v62 = vpack.c.bf16 %v2283_v58, %v2283_v58 }
 0x499   : > { %2585 = vmatprep.mubr.bf16.mxu1 %v2293_v59  ;;  %2625 = vmatprep.mubr.bf16.mxu0 %v2295_v60 }
 0x49a   : > { %2586 = vmatmul.mubr.bf16.vlgmr.msra.gmra.mxu1 %v2292_v61  ;;  %2626 = vmatmul.mubr.bf16.vlgmr.msra.gmra.mxu0 %v2294_v62 }
 0x55a   : > { %v3094_v63 = vpop.f32.mrf.mxu1  ;;  %v3116_v0 = vpop.f32.mrf.mxu0 }
 0x55c   : > { %v3095_v2 = vpop.f32.mrf.mxu1  ;;  %v3117_v3 = vpop.f32.mrf.mxu0 }
 0x55d   : > { %v3096_v4 = vadd.f32 %v3095_v2, %v3094_v63  ;;  %v3118_v8 = vadd.f32 %v3117_v3, %v3116_v0 }
 0x55e   : > { %v3097_v5 = vpop.f32.mrf.mxu1  ;;  %v3119_v6 = vpop.f32.mrf.mxu0 }
 0x55f   : > { %v2588_v7 = vadd.f32 %v3096_v4, %v2360_v1 }
 0x560   : > { %v3098_v9 = vpop.f32.mrf.mxu1  ;;  %v3120_v10 = vpop.f32.mrf.mxu0 }
 0x561   : > { %v2628_v11 = vadd.f32 %v3118_v8, %v2588_v7 }
 0x563   : > { %2633 = vst [vmem:[%s378_s26] sm:$0x1] %v2628_v11 }
 0x564   : > { %3409 = shalt.err (!%p3406_p3)
}
 0x565   : > { %s3410_s30 = scalar_lea.hbm %s2645_s22, 16  ;;  %s3414_s26 = scalar_lea.hbm %s4306_s11, 32 }
 0x566   : > { %p3411_p4 = scmp.ne.s32.totalorder %s2645_s22, %s3410_s30  ;;  %p3415_p9 = scmp.lt.s32.totalorder %s2645_s22, %s4306_s11 }
 0x567   : > { %p3416_p10 = scmp.lt.s32.totalorder %s3414_s26, %s3410_s30 }
 0x568   : > { %p3412_p7 = pnand %p3411_p4, %p3562_p5 }
 0x569   : > { %p3417_p11 = por %p3416_p10, %p3415_p9 }
 0x56a   : > { %p3413_p8 = pneg %p3412_p7 }
 0x56c   : > { %p3418_p12 = pnand %p3417_p11, %p3413_p8 }
 0x56e   : > { %3421 = shalt.err (!%p3418_p12)
}
 0x56f   : > { %3134 = dma.vmem_to_hbm [thread:$0]  (%p3562_p5), %s2648_s16, 16, %s2645_s22, %s2635_s19  }
 0x570 PF: > { %p3140_p13 = scmp.ge.s32.totalorder %s3456_s20, 2  ;;  %s2659_s15 = sand.u32 1, %s3444_s17  }
 0x571   : > { %s2660_s21 = scalar_lea.sflag [#allocation3], %s2659_s15 }
 0x572   : > { %p3137_p0 = pnand %p3140_p13, %p3566_p6 }
 0x574   : > { %p3138_p1 = pneg %p3137_p0 }
 0x576   : > { %3439 = dma.done.wait (%p3138_p1), %s2660_s21, 16  }
 0x577   : > { %3441 = vsyncadd (%p3138_p1), %s2660_s21, 4294967280  ;;  %s4312_s24 = sld [smem:[#allocation5_spill]]  ;;  %p21_p2 = scmp.ge.s32.totalorder %s3549_s23, 4  }
 0x578   : > { %s4313_s19 = sld [smem:[#allocation6_spill]]  ;;  %s4314_s17 = smov %s3448_s18 }
 0x579   : > { %s4316_s20 = smov %s3549_s23  ;;  %23 = sbr.rel (!%p21_p2) target bundleno = 3 (0x3), region = 99 }
 0x57d   : > { %s4315_s18 = smov %s4312_s24 }
 0x57e   :  { %2664 = vsyncpa [#allocation3], 1 }
 0x57f   :  { %2666 = vsyncpa [#allocation3 + $0x1], 1 }

</bundles_post_ra>
